<compile_context>
chip_gen: v6e
topology: v6e:2x2x1
jax: 0.10.0
libtpu: 0.0.40
codegen_flags: <defaults>
</compile_context>

<pallas_src>
import functools

import jax
import jax.numpy as jnp
from jax import lax
from jax.experimental import pallas as pl
from jax.experimental.pallas import tpu as pltpu


def _im2col_3x3(xpad, h_out, w_out, stride):
    """xpad: (H_in+2, W_in+2, C) zero-padded value. Returns (h_out*w_out, 9*C).

    Column layout is tap-major, channel-minor: col[p, (kh*3+kw)*C + c], which
    matches w.reshape(9*C, Cout) of an HWIO (3, 3, C, Cout) weight.
    """
    c = xpad.shape[-1]
    h_span = (h_out - 1) * stride + 1
    w_span = (w_out - 1) * stride + 1
    # Pack the three kw taps along the channel (lane) axis.
    xw = jnp.concatenate(
        [xpad[:, kw:kw + w_span, :] for kw in range(3)], axis=-1)
    if stride != 1:
        xw = xw[:, ::stride, :]       # W decimation hoisted (once, not per tap)
    # Pack the three kh taps along the channel axis.
    col = jnp.concatenate(
        [xw[kh:kh + h_span, :, :] for kh in range(3)], axis=-1)
    if stride != 1:
        col = col[::stride, :, :]     # H decimation hoisted
    return col.reshape(h_out * w_out, 9 * c)


def basic_block_kernel(*refs, stride, H_out, W_out, has_proj):
    if has_proj:
        xp_ref, w1_ref, w2_ref, bn_ref, ws_ref, out_ref = refs
    else:
        xp_ref, w1_ref, w2_ref, bn_ref, out_ref = refs
        ws_ref = None

    xp = xp_ref[0]                       # (Hp, Wp, Cin), bf16
    bn = bn_ref[...]                     # (6, Cout) f32: s1, b1, s2, b2, ss, bs
    Cin = xp.shape[-1]
    Cout = out_ref.shape[-1]
    P = H_out * W_out

    # ---- conv1: 3x3 / stride, tap-fused single MXU matmul (K = 9*Cin) ----
    col1 = _im2col_3x3(xp, H_out, W_out, stride)            # (P, 9*Cin) bf16
    acc1 = jnp.dot(col1, w1_ref[...], preferred_element_type=jnp.float32)

    # BN1 (folded, f32) + ReLU.  Dropout is identity in eval mode.
    # TODO(synk): training-mode dropout (Bernoulli mask) not implemented.
    out1 = jnp.maximum(acc1 * bn[0:1, :] + bn[1:2, :], 0.0)  # (P, Cout) f32

    # ---- conv2: 3x3 / stride 1, tap-fused (K = 9*Cout) ----
    # Zero padding is built at value level (no scratch, no scratch zeroing).
    out1b = out1.astype(jnp.bfloat16).reshape(H_out, W_out, Cout)
    zrow = jnp.zeros((1, W_out, Cout), jnp.bfloat16)
    zcol = jnp.zeros((H_out + 2, 1, Cout), jnp.bfloat16)
    p1 = jnp.concatenate([zrow, out1b, zrow], axis=0)       # pad H
    p1 = jnp.concatenate([zcol, p1, zcol], axis=1)          # pad W
    col2 = _im2col_3x3(p1, H_out, W_out, 1)                 # (P, 9*Cout) bf16
    acc2 = jnp.dot(col2, w2_ref[...], preferred_element_type=jnp.float32)
    out2 = acc2 * bn[2:3, :] + bn[3:4, :]                   # BN2 (folded)

    # ---- shortcut ----
    h_span = (H_out - 1) * stride + 1
    w_span = (W_out - 1) * stride + 1
    xs = xp[1:1 + h_span:stride, 1:1 + w_span:stride, :]    # center tap of x
    if has_proj:
        sc = jnp.dot(xs.reshape(P, Cin), ws_ref[...],
                     preferred_element_type=jnp.float32)
        sc = sc * bn[4:5, :] + bn[5:6, :]                   # shortcut BN (folded)
    else:
        sc = xs.reshape(P, Cout).astype(jnp.float32)        # identity (Cin==Cout)

    out = jnp.maximum(out2 + sc, 0.0)
    # TODO(synk): for small Cout a lane-dense (N, H_out, W_out*Cout) output
    # store would avoid masked vst; kept 4-D here to stay on reshapes Mosaic
    # handles unconditionally.
    out_ref[0] = out.reshape(H_out, W_out, Cout).astype(out_ref.dtype)


def _fold_bn(gamma, beta, mean, var, eps=1e-5):
    scale = gamma / jnp.sqrt(var + eps)
    bias = beta - mean * scale
    return scale, bias


def basic_block_forward(x_nchw, params, stride=1):
    """Pallas forward. Takes/returns NCHW (PyTorch convention)."""
    x = jnp.transpose(x_nchw, (0, 2, 3, 1)).astype(jnp.float32)   # NCHW -> NHWC
    N, H, W, Cin = x.shape
    Cout = params["w1"].shape[-1]
    H_out = (H + 2 - 3) // stride + 1
    W_out = (W + 2 - 3) // stride + 1
    Hp, Wp = H + 2, W + 2

    # bf16 conv operands; f32 accumulation + f32 BN/ReLU epilogue in-kernel.
    xp = jnp.pad(x, ((0, 0), (1, 1), (1, 1), (0, 0))).astype(jnp.bfloat16)
    w1 = params["w1"].reshape(9 * Cin, Cout).astype(jnp.bfloat16)
    w2 = params["w2"].reshape(9 * Cout, Cout).astype(jnp.bfloat16)

    s1, b1 = _fold_bn(params["g1"], params["b1"], params["m1"], params["v1"])
    s2, b2 = _fold_bn(params["g2"], params["b2"], params["m2"], params["v2"])

    has_proj = (stride != 1) or (Cin != Cout)
    if has_proj:
        ws = params["ws"].reshape(Cin, Cout).astype(jnp.bfloat16)
        ss, bs = _fold_bn(params["gs"], params["bets"], params["ms"], params["vs"])
    else:
        ss = jnp.ones((Cout,), jnp.float32)      # unused rows (identity path)
        bs = jnp.zeros((Cout,), jnp.float32)

    bn = jnp.stack([s1, b1, s2, b2, ss, bs], axis=0).astype(jnp.float32)

    kern = functools.partial(basic_block_kernel, stride=stride,
                             H_out=H_out, W_out=W_out, has_proj=has_proj)

    in_specs = [
        pl.BlockSpec((1, Hp, Wp, Cin), lambda n: (n, 0, 0, 0)),
        pl.BlockSpec((9 * Cin, Cout), lambda n: (0, 0)),
        pl.BlockSpec((9 * Cout, Cout), lambda n: (0, 0)),
        pl.BlockSpec((6, Cout), lambda n: (0, 0)),
    ]
    args = [xp, w1, w2, bn]
    if has_proj:
        in_specs.append(pl.BlockSpec((Cin, Cout), lambda n: (0, 0)))
        args.append(ws)

    # TODO(synk): for ImageNet-scale spatial dims add a row-halo grid axis so
    # per-step VMEM stays bounded (and feeds both v7x TensorCores); the whole
    # image fits comfortably in VMEM at these shapes.
    out_nhwc = pl.pallas_call(
        kern,
        out_shape=jax.ShapeDtypeStruct((N, H_out, W_out, Cout), jnp.float32),
        grid_spec=pltpu.PrefetchScalarGridSpec(
            num_scalar_prefetch=0,
            grid=(N,),
            in_specs=in_specs,
            out_specs=pl.BlockSpec((1, H_out, W_out, Cout),
                                   lambda n: (n, 0, 0, 0)),
        ),
        compiler_params=pltpu.CompilerParams(
            dimension_semantics=("parallel",)),
    )(*args)

    return jnp.transpose(out_nhwc, (0, 3, 1, 2))      # NHWC -> NCHW


def init_params(key, in_planes, planes, stride):
    ks = jax.random.split(key, 16)
    p = {
        "w1": jax.random.normal(ks[0], (3, 3, in_planes, planes), jnp.float32) * 0.1,
        "g1": jax.random.uniform(ks[1], (planes,), jnp.float32, 0.5, 1.5),
        "b1": jax.random.normal(ks[2], (planes,), jnp.float32) * 0.1,
        "m1": jax.random.normal(ks[3], (planes,), jnp.float32) * 0.1,
        "v1": jax.random.uniform(ks[4], (planes,), jnp.float32, 0.5, 1.5),
        "w2": jax.random.normal(ks[5], (3, 3, planes, planes), jnp.float32) * 0.1,
        "g2": jax.random.uniform(ks[6], (planes,), jnp.float32, 0.5, 1.5),
        "b2": jax.random.normal(ks[7], (planes,), jnp.float32) * 0.1,
        "m2": jax.random.normal(ks[8], (planes,), jnp.float32) * 0.1,
        "v2": jax.random.uniform(ks[9], (planes,), jnp.float32, 0.5, 1.5),
    }
    if stride != 1 or in_planes != planes:
        p.update({
            "ws": jax.random.normal(ks[10], (1, 1, in_planes, planes), jnp.float32) * 0.1,
            "gs": jax.random.uniform(ks[11], (planes,), jnp.float32, 0.5, 1.5),
            "bets": jax.random.normal(ks[12], (planes,), jnp.float32) * 0.1,
            "ms": jax.random.normal(ks[13], (planes,), jnp.float32) * 0.1,
            "vs": jax.random.uniform(ks[14], (planes,), jnp.float32, 0.5, 1.5),
        })
    return p


def ref_forward(x_nchw, params, stride=1, eps=1e-5):
    """Pure-JAX reference (lax.conv), eval-mode BatchNorm, identity dropout."""
    x = jnp.transpose(x_nchw, (0, 2, 3, 1)).astype(jnp.float32)
    dn = ("NHWC", "HWIO", "NHWC")

    def conv(v, w, s, pad):
        return lax.conv_general_dilated(v, w, (s, s), pad, dimension_numbers=dn)

    def bn(v, g, b, m, var):
        return (v - m) / jnp.sqrt(var + eps) * g + b

    out = jax.nn.relu(bn(conv(x, params["w1"], stride, ((1, 1), (1, 1))),
                         params["g1"], params["b1"], params["m1"], params["v1"]))
    out = bn(conv(out, params["w2"], 1, ((1, 1), (1, 1))),
             params["g2"], params["b2"], params["m2"], params["v2"])
    Cin, Cout = x.shape[-1], params["w1"].shape[-1]
    if stride != 1 or Cin != Cout:
        sc = conv(x, params["ws"], stride, ((0, 0), (0, 0)))
        sc = bn(sc, params["gs"], params["bets"], params["ms"], params["vs"])
    else:
        sc = x
    out = jax.nn.relu(out + sc)
    return jnp.transpose(out, (0, 3, 1, 2))


if __name__ == "__main__":
    N, in_planes, H, W = 2, 4, 16, 16
    planes, stride = 8, 1                 # exercises the 1x1-conv+BN shortcut

    key = jax.random.PRNGKey(0)
    kx, kp = jax.random.split(key)
    x = jax.random.normal(kx, (N, in_planes, H, W), jnp.float32)
    params = init_params(kp, in_planes, planes, stride)

    out = basic_block_forward(x, params, stride=stride)
    out = jax.block_until_ready(out)

    ref = ref_forward(x, params, stride=stride)
    assert out.shape == (N, planes, H // stride, W // stride), out.shape
    max_err = float(jnp.max(jnp.abs(out - ref)))
    # bf16 conv operands (f32 accumulation) vs. a pure-f32 reference.
    assert max_err < 5e-2, f"mismatch vs reference: {max_err}"
    print("KERNEL_OK")
</pallas_src>

<mosaic_0001>
module attributes {stable_mosaic.version = 11 : i64} {
  func.func @basic_block_kernel(%arg0: i32, %arg1: memref<1x18x18x4xbf16, #tpu.memory_space<vmem>>, %arg2: memref<36x8xbf16, #tpu.memory_space<vmem>>, %arg3: memref<72x8xbf16, #tpu.memory_space<vmem>>, %arg4: memref<6x8xf32, #tpu.memory_space<vmem>>, %arg5: memref<4x8xbf16, #tpu.memory_space<vmem>>, %arg6: memref<1x16x16x8xf32, #tpu.memory_space<vmem>>) attributes {dimension_semantics = [#tpu.dimension_semantics<parallel>], iteration_bounds = array<i64: 2>, scalar_prefetch = 0 : i64, scratch_operands = 0 : i64, tpu.core_type = #tpu.core_type<tc>, window_params = [{transform_indices = @transform_0, window_bounds = array<i64: 1, 18, 18, 4>}, {pipeline_mode = #tpu.pipeline_mode<synchronous>, transform_indices = @transform_1, window_bounds = array<i64: 36, 8>}, {pipeline_mode = #tpu.pipeline_mode<synchronous>, transform_indices = @transform_2, window_bounds = array<i64: 72, 8>}, {pipeline_mode = #tpu.pipeline_mode<synchronous>, transform_indices = @transform_3, window_bounds = array<i64: 6, 8>}, {pipeline_mode = #tpu.pipeline_mode<synchronous>, transform_indices = @transform_4, window_bounds = array<i64: 4, 8>}, {transform_indices = @transform_5, window_bounds = array<i64: 1, 16, 16, 8>}]} {
    %c0 = arith.constant 0 : index
    %c0_0 = arith.constant 0 : index
    %c0_1 = arith.constant 0 : index
    %c0_2 = arith.constant 0 : index
    %0 = vector.load %arg1[%c0, %c0_0, %c0_1, %c0_2] : memref<1x18x18x4xbf16, #tpu.memory_space<vmem>>, vector<1x18x18x4xbf16>
    %1 = vector.shape_cast %0 : vector<1x18x18x4xbf16> to vector<18x18x4xbf16>
    %c0_3 = arith.constant 0 : index
    %c0_4 = arith.constant 0 : index
    %2 = vector.load %arg4[%c0_3, %c0_4] : memref<6x8xf32, #tpu.memory_space<vmem>>, vector<6x8xf32>
    %3 = vector.extract_strided_slice %1 {offsets = [0, 0, 0], sizes = [18, 16, 4], strides = [1, 1, 1]} : vector<18x18x4xbf16> to vector<18x16x4xbf16>
    %4 = vector.extract_strided_slice %1 {offsets = [0, 1, 0], sizes = [18, 16, 4], strides = [1, 1, 1]} : vector<18x18x4xbf16> to vector<18x16x4xbf16>
    %5 = vector.extract_strided_slice %1 {offsets = [0, 2, 0], sizes = [18, 16, 4], strides = [1, 1, 1]} : vector<18x18x4xbf16> to vector<18x16x4xbf16>
    %6 = tpu.concatenate %3, %4, %5 in 2 : vector<18x16x4xbf16>, vector<18x16x4xbf16>, vector<18x16x4xbf16> -> vector<18x16x12xbf16>
    %7 = vector.extract_strided_slice %6 {offsets = [0, 0, 0], sizes = [16, 16, 12], strides = [1, 1, 1]} : vector<18x16x12xbf16> to vector<16x16x12xbf16>
    %8 = vector.extract_strided_slice %6 {offsets = [1, 0, 0], sizes = [16, 16, 12], strides = [1, 1, 1]} : vector<18x16x12xbf16> to vector<16x16x12xbf16>
    %9 = vector.extract_strided_slice %6 {offsets = [2, 0, 0], sizes = [16, 16, 12], strides = [1, 1, 1]} : vector<18x16x12xbf16> to vector<16x16x12xbf16>
    %10 = tpu.concatenate %7, %8, %9 in 2 : vector<16x16x12xbf16>, vector<16x16x12xbf16>, vector<16x16x12xbf16> -> vector<16x16x36xbf16>
    %11 = vector.shape_cast %10 : vector<16x16x36xbf16> to vector<256x36xbf16>
    %c0_5 = arith.constant 0 : index
    %c0_6 = arith.constant 0 : index
    %12 = vector.load %arg2[%c0_5, %c0_6] : memref<36x8xbf16, #tpu.memory_space<vmem>>, vector<36x8xbf16>
    %cst = arith.constant dense<0.000000e+00> : vector<256x8xf32>
    %13 = tpu.matmul %11, %12, %cst {dimension_numbers = #tpu.dot_dimension_numbers<[1], [0], [0], [1], [0, 0, 1, 1], [], []>} : vector<256x36xbf16>, vector<36x8xbf16>, vector<256x8xf32> -> vector<256x8xf32>
    %14 = vector.extract_strided_slice %2 {offsets = [0, 0], sizes = [1, 8], strides = [1, 1]} : vector<6x8xf32> to vector<1x8xf32>
    %15 = vector.broadcast %14 : vector<1x8xf32> to vector<256x8xf32>
    %16 = arith.mulf %13, %15 : vector<256x8xf32>
    %17 = vector.extract_strided_slice %2 {offsets = [1, 0], sizes = [1, 8], strides = [1, 1]} : vector<6x8xf32> to vector<1x8xf32>
    %18 = vector.broadcast %17 : vector<1x8xf32> to vector<256x8xf32>
    %19 = arith.addf %16, %18 : vector<256x8xf32>
    %cst_7 = arith.constant 0.000000e+00 : f32
    %20 = vector.broadcast %cst_7 : f32 to vector<256x8xf32>
    %21 = arith.maximumf %19, %20 : vector<256x8xf32>
    %22 = arith.truncf %21 : vector<256x8xf32> to vector<256x8xbf16>
    %23 = vector.shape_cast %22 : vector<256x8xbf16> to vector<16x16x8xbf16>
    %cst_8 = arith.constant 0.000000e+00 : bf16
    %24 = vector.broadcast %cst_8 : bf16 to vector<1x16x8xbf16>
    %cst_9 = arith.constant 0.000000e+00 : bf16
    %25 = vector.broadcast %cst_9 : bf16 to vector<18x1x8xbf16>
    %26 = tpu.concatenate %24, %23, %24 in 0 : vector<1x16x8xbf16>, vector<16x16x8xbf16>, vector<1x16x8xbf16> -> vector<18x16x8xbf16>
    %27 = tpu.concatenate %25, %26, %25 in 1 : vector<18x1x8xbf16>, vector<18x16x8xbf16>, vector<18x1x8xbf16> -> vector<18x18x8xbf16>
    %28 = vector.extract_strided_slice %27 {offsets = [0, 0, 0], sizes = [18, 16, 8], strides = [1, 1, 1]} : vector<18x18x8xbf16> to vector<18x16x8xbf16>
    %29 = vector.extract_strided_slice %27 {offsets = [0, 1, 0], sizes = [18, 16, 8], strides = [1, 1, 1]} : vector<18x18x8xbf16> to vector<18x16x8xbf16>
    %30 = vector.extract_strided_slice %27 {offsets = [0, 2, 0], sizes = [18, 16, 8], strides = [1, 1, 1]} : vector<18x18x8xbf16> to vector<18x16x8xbf16>
    %31 = tpu.concatenate %28, %29, %30 in 2 : vector<18x16x8xbf16>, vector<18x16x8xbf16>, vector<18x16x8xbf16> -> vector<18x16x24xbf16>
    %32 = vector.extract_strided_slice %31 {offsets = [0, 0, 0], sizes = [16, 16, 24], strides = [1, 1, 1]} : vector<18x16x24xbf16> to vector<16x16x24xbf16>
    %33 = vector.extract_strided_slice %31 {offsets = [1, 0, 0], sizes = [16, 16, 24], strides = [1, 1, 1]} : vector<18x16x24xbf16> to vector<16x16x24xbf16>
    %34 = vector.extract_strided_slice %31 {offsets = [2, 0, 0], sizes = [16, 16, 24], strides = [1, 1, 1]} : vector<18x16x24xbf16> to vector<16x16x24xbf16>
    %35 = tpu.concatenate %32, %33, %34 in 2 : vector<16x16x24xbf16>, vector<16x16x24xbf16>, vector<16x16x24xbf16> -> vector<16x16x72xbf16>
    %36 = vector.shape_cast %35 : vector<16x16x72xbf16> to vector<256x72xbf16>
    %c0_10 = arith.constant 0 : index
    %c0_11 = arith.constant 0 : index
    %37 = vector.load %arg3[%c0_10, %c0_11] : memref<72x8xbf16, #tpu.memory_space<vmem>>, vector<72x8xbf16>
    %cst_12 = arith.constant dense<0.000000e+00> : vector<256x8xf32>
    %38 = tpu.matmul %36, %37, %cst_12 {dimension_numbers = #tpu.dot_dimension_numbers<[1], [0], [0], [1], [0, 0, 1, 1], [], []>} : vector<256x72xbf16>, vector<72x8xbf16>, vector<256x8xf32> -> vector<256x8xf32>
    %39 = vector.extract_strided_slice %2 {offsets = [2, 0], sizes = [1, 8], strides = [1, 1]} : vector<6x8xf32> to vector<1x8xf32>
    %40 = vector.broadcast %39 : vector<1x8xf32> to vector<256x8xf32>
    %41 = arith.mulf %38, %40 : vector<256x8xf32>
    %42 = vector.extract_strided_slice %2 {offsets = [3, 0], sizes = [1, 8], strides = [1, 1]} : vector<6x8xf32> to vector<1x8xf32>
    %43 = vector.broadcast %42 : vector<1x8xf32> to vector<256x8xf32>
    %44 = arith.addf %41, %43 : vector<256x8xf32>
    %45 = vector.extract_strided_slice %1 {offsets = [1, 1, 0], sizes = [16, 16, 4], strides = [1, 1, 1]} : vector<18x18x4xbf16> to vector<16x16x4xbf16>
    %46 = vector.shape_cast %45 : vector<16x16x4xbf16> to vector<256x4xbf16>
    %c0_13 = arith.constant 0 : index
    %c0_14 = arith.constant 0 : index
    %47 = vector.load %arg5[%c0_13, %c0_14] : memref<4x8xbf16, #tpu.memory_space<vmem>>, vector<4x8xbf16>
    %cst_15 = arith.constant dense<0.000000e+00> : vector<256x8xf32>
    %48 = tpu.matmul %46, %47, %cst_15 {dimension_numbers = #tpu.dot_dimension_numbers<[1], [0], [0], [1], [0, 0, 1, 1], [], []>} : vector<256x4xbf16>, vector<4x8xbf16>, vector<256x8xf32> -> vector<256x8xf32>
    %49 = vector.extract_strided_slice %2 {offsets = [4, 0], sizes = [1, 8], strides = [1, 1]} : vector<6x8xf32> to vector<1x8xf32>
    %50 = vector.broadcast %49 : vector<1x8xf32> to vector<256x8xf32>
    %51 = arith.mulf %48, %50 : vector<256x8xf32>
    %52 = vector.extract_strided_slice %2 {offsets = [5, 0], sizes = [1, 8], strides = [1, 1]} : vector<6x8xf32> to vector<1x8xf32>
    %53 = vector.broadcast %52 : vector<1x8xf32> to vector<256x8xf32>
    %54 = arith.addf %51, %53 : vector<256x8xf32>
    %55 = arith.addf %44, %54 : vector<256x8xf32>
    %cst_16 = arith.constant 0.000000e+00 : f32
    %56 = vector.broadcast %cst_16 : f32 to vector<256x8xf32>
    %57 = arith.maximumf %55, %56 : vector<256x8xf32>
    %58 = vector.shape_cast %57 : vector<256x8xf32> to vector<16x16x8xf32>
    %c0_17 = arith.constant 0 : index
    %c0_18 = arith.constant 0 : index
    %c0_19 = arith.constant 0 : index
    %c0_20 = arith.constant 0 : index
    %59 = vector.load %arg6[%c0_17, %c0_18, %c0_19, %c0_20] : memref<1x16x16x8xf32, #tpu.memory_space<vmem>>, vector<1x16x16x8xf32>
    %60 = vector.shape_cast %59 : vector<1x16x16x8xf32> to vector<16x16x8xf32>
    %61 = vector.shape_cast %58 : vector<16x16x8xf32> to vector<1x16x16x8xf32>
    tpu.vector_store %arg6[%c0_17, %c0_18, %c0_19, %c0_20], %61 {strides = array<i32>} : memref<1x16x16x8xf32, #tpu.memory_space<vmem>>, vector<1x16x16x8xf32>,
    return
  }
  func.func @transform_0(%arg0: i32) -> (i32, i32, i32, i32) {
    %c0_i32 = arith.constant 0 : i32
    %c0_i32_0 = arith.constant 0 : i32
    %c0_i32_1 = arith.constant 0 : i32
    %c0_i32_2 = arith.constant 0 : i32
    return %arg0, %c0_i32, %c0_i32_0, %c0_i32_1 : i32, i32, i32, i32
  }
  func.func @transform_1(%arg0: i32) -> (i32, i32) {
    %c0_i32 = arith.constant 0 : i32
    %c0_i32_0 = arith.constant 0 : i32
    %c0_i32_1 = arith.constant 0 : i32
    return %c0_i32, %c0_i32_0 : i32, i32
  }
  func.func @transform_2(%arg0: i32) -> (i32, i32) {
    %c0_i32 = arith.constant 0 : i32
    %c0_i32_0 = arith.constant 0 : i32
    %c0_i32_1 = arith.constant 0 : i32
    return %c0_i32, %c0_i32_0 : i32, i32
  }
  func.func @transform_3(%arg0: i32) -> (i32, i32) {
    %c0_i32 = arith.constant 0 : i32
    %c0_i32_0 = arith.constant 0 : i32
    %c0_i32_1 = arith.constant 0 : i32
    return %c0_i32, %c0_i32_0 : i32, i32
  }
  func.func @transform_4(%arg0: i32) -> (i32, i32) {
    %c0_i32 = arith.constant 0 : i32
    %c0_i32_0 = arith.constant 0 : i32
    %c0_i32_1 = arith.constant 0 : i32
    return %c0_i32, %c0_i32_0 : i32, i32
  }
  func.func @transform_5(%arg0: i32) -> (i32, i32, i32, i32) {
    %c0_i32 = arith.constant 0 : i32
    %c0_i32_0 = arith.constant 0 : i32
    %c0_i32_1 = arith.constant 0 : i32
    %c0_i32_2 = arith.constant 0 : i32
    return %arg0, %c0_i32, %c0_i32_0, %c0_i32_1 : i32, i32, i32, i32
  }
}

</mosaic_0001>

<bundles_post_ra>
// kernel: tpu_custom_call.1
= control target key start
LH: loop header
LB: loop body
LE: loop exit
PB: predicated region body
PF: predicated region fallthrough
CT: control target
= control target key end

     0   :  { %s3718_s18 = smov 0   ;;  %s5225_s0 = inlined_call_operand.vmem [shape: bf16[2,18,18,4], index: 0, kind: input, shape index: {}]   ;;  %s5226_s1 = inlined_call_operand.vmem [shape: bf16[36,8], index: 1, kind: input, shape index: {}]   ;;  %s5227_s2 = inlined_call_operand.vmem [shape: bf16[72,8], index: 2, kind: input, shape index: {}]   ;;  %s5228_s3 = inlined_call_operand.vmem [shape: f32[6,8], index: 3, kind: input, shape index: {}]   ;;  %s5229_s4 = inlined_call_operand.vmem [shape: bf16[4,8], index: 4, kind: input, shape index: {}]   ;;  %s5230_s5 = inlined_call_operand.vmem [shape: f32[2,16,16,8], index: 5, kind: output, shape index: {}]  }
   0x1 LB: > { %s3267_s19 = sadd.s32 4294967295, %s3679_s18   ;;  %p3271_p0 = scmp.ge.s32.totalorder %s3679_s18, 1  ;;  %s3679_s18 = sphi %s3718_s18, %s15_s18  }
   0x2   : > { %p187_p1 = scmp.lt.s32.totalorder %s3679_s18, 3 }
   0x4   : > { %p188_p2 = pnand %p3271_p0, %p187_p1 }
   0x5   : > { %p215_p3 = scmp.lt.s32.totalorder (!%p188_p2), %s3267_s19, 1  ;;  %s3681_s24 = smov (!%p188_p2), 8  }
   0x6   : > { %191 = sbr.rel (%p188_p2) target bundleno = 1040 (0x410), region = 40  ;;  %s3682_s25 = smov (!%p188_p2), 4  }
   0x7   : > { %s3683_s7 = smov (!%p188_p2), 12   ;;  %s3684_s8 = smov (!%p188_p2), 24  }
   0x8   : > { %s3685_s11 = smov (!%p188_p2), 16  }
   0xb   : > { %s5236_s19 = smov (!%p215_p3, %s3267_s19), 1  ;;  %vm2396_vm0 = vsmask.f32 3328  ;;  %vm2397_vm1 = vsmask.f32 7440  ;;  %vm678_vm2 = vcmask 1046528  }
   0xc   : > { %s3567_s20 = smul.u32 216, %s5236_s19  ;;  %vm3756_vm3 = vmor %vm2396_vm0, %vm2397_vm1  ;;  %vm425_vm4 = vsmask.f32 7424  ;;  %vm1043_vm5 = vcmask 1041408   ;;  %vm769_vm6 = vcmask 31744   ;;  %vm806_vm7 = vcmask 64512  }
   0xd   : > { %vm924_vm8 = vcmask 97280   ;;  %vm957_vm9 = vcmask 195584   ;;  %vm1010_vm10 = vcmask 293888   ;;  %vm1481_vm11 = vcmask 1040384   ;;  %s3385_s29 = sshll.u32 %s5236_s19, 8 }
   0xe   : > { %s3732_s23 = scalar_lea.vmem %s5225_s0, %s3567_s20  ;;  %vm1482_vm12 = vsmask.f32 256  ;;  %vm1909_vm14 = vcmask 130048   ;;  %vm2159_vm15 = vcmask 1043456   ;;  %vm2057_vm0 = vcmask 392192   ;;  %s5014_s6 = scalar_lea.vmem %s5230_s5, %s3385_s29 }
   0xf   : > { %v232_v0 = vld [vmem:[%s3732_s23 + $0x18] sm:$0xf]  ;;  %v233_v1 = vld [vmem:[%s3732_s23 + $0x1c] sm:$0xf]  ;;  %v234_v2 = vld [vmem:[%s3732_s23 + $0x20] sm:$0x1] }
  0x10   : > { %v3737_v3 = vcombine.low %v232_v0, %v233_v1  ;;  %v3739_v4 = vcombine.low %v234_v2, %v234_v2  ;;  %v2424_v5 = vshrl.u32 %v232_v0, 16  ;;  %v2427_v6 = vshll.u32 %v232_v0, 16  ;;  %v229_v7 = vld [vmem:[%s3732_s23 + $0xc] sm:$0xf]  ;;  %v230_v8 = vld [vmem:[%s3732_s23 + $0x10] sm:$0xf]  ;;  %vm4219_vm13 = vmand %vm1481_vm11, %vm1482_vm12 }
  0x11   : > { %v2433_v9 = vshll.u32 %v233_v1, 16  ;;  %v2437_v10 = vshrl.u32 %v233_v1, 16  ;;  %v2443_v11 = vshll.u32 %v234_v2, 16  ;;  %v231_v12 = vld [vmem:[%s3732_s23 + $0x14] sm:$0x1]  ;;  %v3744_v13 = vcombine.low %v229_v7, %v230_v8 }
  0x12   : > { %v685_v14 = vrot.slane %v3737_v3, 1  ;;  %v686_v15 = vrot.slane %v3739_v4, 1  ;;  %v2426_v16 = vrot.slane %v2424_v5, 4  ;;  %v2429_v17 = vrot.slane %v2427_v6, 5  ;;  %v238_v18 = vld [vmem:[%s3732_s23 + $0x30] sm:$0xf] }
  0x13   : > { %v2435_v19 = vrot.slane %v2433_v9, 5  ;;  %v2439_v20 = vrot.slane %v2437_v10, 4  ;;  %v3294_v21 = vcombine.low %v231_v12, %v231_v12  ;;  %v239_v22 = vld [vmem:[%s3732_s23 + $0x34] sm:$0xf]  ;;  %v2445_v25 = vrot.slane %v2443_v11, 5 }
  0x14   : > { %v687_v23 = vsel %vm678_vm2, %v685_v14, %v686_v15  ;;  %v2430_v24 = vor.u32 %v2429_v17, %v2426_v16  ;;  %v682_v26 = vrot.slane %v3744_v13, 1  ;;  %v240_v27 = vld [vmem:[%s3732_s23 + $0x38] sm:$0x1]  ;;  %v235_v28 = vld [vmem:[%s3732_s23 + $0x24] sm:$0xf]  ;;  %v3761_v32 = vcombine.low %v238_v18, %v239_v22 }
  0x15   : > { %v2440_v30 = vor.u32 %v2439_v20, %v2435_v19  ;;  %737 = vrot.lane.b32.xlu0 %v687_v23, %s3681_s24  ;;  %v683_v31 = vrot.slane %v3294_v21, 1  ;;  %v3763_v33 = vcombine.low %v240_v27, %v240_v27  ;;  %v236_v34 = vld [vmem:[%s3732_s23 + $0x28] sm:$0xf]  ;;  %v237_v35 = vld [vmem:[%s3732_s23 + $0x2c] sm:$0x1]  ;;  %v439_v55 = vshrl.u32 %v3744_v13, 16 }
  0x16   : > { %v2431_v36 = vrot.slane %v2430_v24, 4  ;;  %v3767_v37 = vcombine.low %v235_v28, %v236_v34  ;;  %v241_v38 = vld [vmem:[%s3732_s23 + $0x3c] sm:$0xf]  ;;  %v691_v41 = vrot.slane %v3761_v32, 1  ;;  %v242_v43 = vld [vmem:[%s3732_s23 + $0x40] sm:$0xf]  ;;  %v3296_v45 = vcombine.low %v237_v35, %v237_v35 }
  0x17   : > { %v2441_v39 = vrot.slane %v2440_v30, 4  ;;  %v684_v40 = vsel %vm678_vm2, %v682_v26, %v683_v31  ;;  %v692_v42 = vrot.slane %v3763_v33, 1  ;;  %v243_v47 = vld [vmem:[%s3732_s23 + $0x44] sm:$0x1]  ;;  %v3782_v50 = vcombine.low %v241_v38, %v242_v43  ;;  %v244_v6 = vld [vmem:[%s3732_s23 + $0x48] sm:$0xf] }
  0x18   : > { %v2436_v44 = vsel %vm3756_vm3, %v2431_v36, %v2435_v19  ;;  %735 = vrot.lane.b32.xlu1 %v684_v40, %s3681_s24  ;;  %v688_v46 = vrot.slane %v3767_v37, 1  ;;  %v689_v52 = vrot.slane %v3296_v45, 1  ;;  %v3298_v53 = vcombine.low %v243_v47, %v243_v47  ;;  %v245_v11 = vld [vmem:[%s3732_s23 + $0x4c] sm:$0xf]  ;;  %v246_v17 = vld [vmem:[%s3732_s23 + $0x50] sm:$0x1] }
  0x19   : > { %v2446_v48 = vsel %vm3756_vm3, %v2441_v39, %v2445_v25  ;;  %v693_v49 = vsel %vm678_vm2, %v691_v41, %v692_v42  ;;  %v694_v54 = vrot.slane %v3782_v50, 1  ;;  %v441_v56 = vshll.u32 %v3744_v13, 16  ;;  %v247_v30 = vld [vmem:[%s3732_s23 + $0x54] sm:$0xf]  ;;  %v248_v31 = vld [vmem:[%s3732_s23 + $0x58] sm:$0xf] }
  0x1a   : > { %v3784_v51 = vcombine.low %v2436_v44, %v2446_v48  ;;  %741 = vrot.lane.b32.xlu0 %v693_v49, %s3681_s24  ;;  %v690_v57 = vsel %vm678_vm2, %v688_v46, %v689_v52  ;;  %v695_v58 = vrot.slane %v3298_v53, 1  ;;  %v446_v59 = vshll.u32 %v3294_v21, 16  ;;  %v249_v38 = vld [vmem:[%s3732_s23 + $0x5c] sm:$0x1]  ;;  %v250_v48 = vld [vmem:[%s3732_s23 + $0x60] sm:$0xf] }
  0x1b   : > { %v443_v60 = vrot.slane %v441_v56, 1  ;;  %v463_v61 = vshrl.u32 %v3767_v37, 16  ;;  %v465_v62 = vshll.u32 %v3767_v37, 16  ;;  %v470_v63 = vshll.u32 %v3296_v45, 16  ;;  %v251_v49 = vld [vmem:[%s3732_s23 + $0x64] sm:$0xf] }
  0x1c   : > { %739 = vrot.lane.b32.xlu1 %v690_v57, %s3681_s24  ;;  %v696_v0 = vsel %vm678_vm2, %v694_v54, %v695_v58  ;;  %v448_v1 = vrot.slane %v446_v59, 1  ;;  %v451_v2 = vshrl.u32 %v3737_v3, 16  ;;  %v453_v5 = vshll.u32 %v3737_v3, 16  ;;  %v253_v58 = vld [vmem:[%s3732_s23 + $0x6c] sm:$0xf] }
  0x1d   : > { %v444_v7 = vor.u32 %v443_v60, %v439_v55  ;;  %v467_v8 = vrot.slane %v465_v62, 1  ;;  %v472_v9 = vrot.slane %v470_v63, 1  ;;  %v458_v10 = vshll.u32 %v3739_v4, 16  ;;  %v252_v55 = vld [vmem:[%s3732_s23 + $0x68] sm:$0x1] }
  0x1e   : > { %v455_v12 = vrot.slane %v453_v5, 1  ;;  %v487_v14 = vshrl.u32 %v3782_v50, 16  ;;  %v489_v15 = vshll.u32 %v3782_v50, 16  ;;  %v494_v16 = vshll.u32 %v3298_v53, 16  ;;  %v254_v59 = vld [vmem:[%s3732_s23 + $0x70] sm:$0xf] }
  0x1f   : > { %v449_v18 = vsel %vm425_vm4, %v444_v7, %v448_v1  ;;  %v468_v19 = vor.u32 %v467_v8, %v463_v61  ;;  %v460_v20 = vrot.slane %v458_v10, 1  ;;  %v475_v21 = vshrl.u32 %v3761_v32, 16 }
  0x20   : > { %743 = vrot.lane.b32.xlu1 %v696_v0, %s3681_s24  ;;  %644 = vrot.lane.b32.xlu0 %v449_v18, %s3682_s25  ;;  %v456_v4 = vor.u32 %v455_v12, %v451_v2  ;;  %v491_v22 = vrot.slane %v489_v15, 1  ;;  %v496_v23 = vrot.slane %v494_v16, 1  ;;  %v477_v24 = vshll.u32 %v3761_v32, 16  ;;  %v255_v0 = vld [vmem:[%s3732_s23 + $0x74] sm:$0x1] }
  0x21   : > { %v473_v25 = vsel %vm425_vm4, %v468_v19, %v472_v9  ;;  %v482_v26 = vshll.u32 %v3763_v33, 16  ;;  %v3810_v27 = vcombine.low %v244_v6, %v245_v11  ;;  %v3299_v28 = vcombine.low %v246_v17, %v246_v17  ;;  %v256_v11 = vld [vmem:[%s3732_s23 + $0x78] sm:$0xf]  ;;  %v257_v16 = vld [vmem:[%s3732_s23 + $0x7c] sm:$0xf] }
  0x22   : > { %v461_v34 = vsel %vm425_vm4, %v456_v4, %v460_v20  ;;  %v492_v35 = vor.u32 %v491_v22, %v487_v14  ;;  %v479_v36 = vrot.slane %v477_v24, 1  ;;  %v3821_v44 = vcombine.low %v247_v30, %v248_v31  ;;  %v258_v19 = vld [vmem:[%s3732_s23 + $0x80] sm:$0x1] }
  0x23   : > { %v484_v39 = vrot.slane %v482_v26, 1  ;;  %v499_v40 = vshrl.u32 %v3810_v27, 16  ;;  %v501_v33 = vshll.u32 %v3810_v27, 16  ;;  %v506_v41 = vshll.u32 %v3299_v28, 16  ;;  %v259_v26 = vld [vmem:[%s3732_s23 + $0x84] sm:$0xf] }
  0x24   : > { %648 = vrot.lane.b32.xlu1 %v473_v25, %s3682_s25  ;;  %646 = vrot.lane.b32.xlu0 %v461_v34, %s3682_s25  ;;  %v497_v42 = vsel %vm425_vm4, %v492_v35, %v496_v23  ;;  %v480_v43 = vor.u32 %v479_v36, %v475_v21  ;;  %v3300_v47 = vcombine.low %v249_v38, %v249_v38  ;;  %v511_v53 = vshrl.u32 %v3821_v44, 16  ;;  %v260_v34 = vld [vmem:[%s3732_s23 + $0x88] sm:$0xf]  ;;  %v261_v35 = vld [vmem:[%s3732_s23 + $0x8c] sm:$0x1] }
  0x25   : > { %v503_v45 = vrot.slane %v501_v33, 1  ;;  %v508_v46 = vrot.slane %v506_v41, 1  ;;  %v513_v54 = vshll.u32 %v3821_v44, 16  ;;  %v697_v61 = vrot.slane %v3810_v27, 1 }
  0x26   : > { %v485_v52 = vsel %vm425_vm4, %v480_v43, %v484_v39  ;;  %v518_v57 = vshll.u32 %v3300_v47, 16  ;;  %v698_v62 = vrot.slane %v3299_v28, 1  ;;  %v3834_v63 = vcombine.low %v250_v48, %v251_v49 }
  0x27   : > { %v504_v56 = vor.u32 %v503_v45, %v499_v40  ;;  %v515_v60 = vrot.slane %v513_v54, 1  ;;  %v700_v5 = vrot.slane %v3821_v44, 1  ;;  %v3301_v6 = vcombine.low %v252_v55, %v252_v55  ;;  %v266_v54 = vld [vmem:[%s3732_s23 + $0xa0] sm:$0xf] }
  0x28   : > { %652 = vrot.lane.b32.xlu1 %v497_v42, %s3682_s25  ;;  %650 = vrot.lane.b32.xlu0 %v485_v52, %s3682_s25  ;;  %v520_v2 = vrot.slane %v518_v57, 1  ;;  %v701_v8 = vrot.slane %v3300_v47, 1  ;;  %v523_v9 = vshrl.u32 %v3834_v63, 16  ;;  %v525_v10 = vshll.u32 %v3834_v63, 16  ;;  %v267_v57 = vld [vmem:[%s3732_s23 + $0xa4] sm:$0x1] }
  0x29   : > { %v509_v1 = vsel %vm425_vm4, %v504_v56, %v508_v46  ;;  %v516_v7 = vor.u32 %v515_v60, %v511_v53  ;;  %v530_v12 = vshll.u32 %v3301_v6, 16  ;;  %v3842_v14 = vcombine.low %v253_v58, %v254_v59  ;;  %v265_v53 = vld [vmem:[%s3732_s23 + $0x9c] sm:$0xf] }
  0x2a   : > { %v3302_v15 = vcombine.low %v255_v0, %v255_v0  ;;  %v527_v18 = vrot.slane %v525_v10, 1  ;;  %v699_v20 = vsel %vm678_vm2, %v697_v61, %v698_v62  ;;  %v702_v23 = vsel %vm678_vm2, %v700_v5, %v701_v8  ;;  %v262_v62 = vld [vmem:[%s3732_s23 + $0x90] sm:$0xf]  ;;  %v263_v5 = vld [vmem:[%s3732_s23 + $0x94] sm:$0xf] }
  0x2b   : > { %v521_v17 = vsel %vm425_vm4, %v516_v7, %v520_v2  ;;  %v532_v21 = vrot.slane %v530_v12, 1  ;;  %v535_v4 = vshrl.u32 %v3842_v14, 16  ;;  %v537_v22 = vshll.u32 %v3842_v14, 16 }
  0x2c   : > { %654 = vrot.lane.b32.xlu0 %v509_v1, %s3682_s25  ;;  %656 = vrot.lane.b32.xlu1 %v521_v17, %s3682_s25  ;;  %v528_v24 = vor.u32 %v527_v18, %v523_v9  ;;  %v542_v25 = vshll.u32 %v3302_v15, 16  ;;  %v703_v30 = vrot.slane %v3834_v63, 1  ;;  %v3855_v31 = vcombine.low %v256_v11, %v257_v16 }
  0x2d   : > { %v539_v28 = vrot.slane %v537_v22, 1  ;;  %v704_v38 = vrot.slane %v3301_v6, 1  ;;  %v706_v39 = vrot.slane %v3842_v14, 1  ;;  %v3303_v40 = vcombine.low %v258_v19, %v258_v19  ;;  %v264_v6 = vld [vmem:[%s3732_s23 + $0x98] sm:$0x1] }
  0x2e   : > { %v544_v36 = vrot.slane %v542_v25, 1  ;;  %v533_v33 = vsel %vm425_vm4, %v528_v24, %v532_v21  ;;  %v547_v42 = vshrl.u32 %v3855_v31, 16  ;;  %v549_v43 = vshll.u32 %v3855_v31, 16  ;;  %v272_v24 = vld [vmem:[%s3732_s23 + $0xb8] sm:$0xf] }
  0x2f   : > { %v540_v41 = vor.u32 %v539_v28, %v535_v4  ;;  %v707_v45 = vrot.slane %v3302_v15, 1  ;;  %v554_v46 = vshll.u32 %v3303_v40, 16  ;;  %v3865_v47 = vcombine.low %v259_v26, %v260_v34  ;;  %v273_v28 = vld [vmem:[%s3732_s23 + $0xbc] sm:$0x1]  ;;  %v268_v34 = vld [vmem:[%s3732_s23 + $0xa8] sm:$0xf] }
  0x30   : > { %745 = vrot.lane.b32.xlu0 %v699_v20, %s3681_s24  ;;  %747 = vrot.lane.b32.xlu1 %v702_v23, %s3681_s24  ;;  %v3304_v48 = vcombine.low %v261_v35, %v261_v35  ;;  %v551_v52 = vrot.slane %v549_v43, 1  ;;  %v705_v58 = vsel %vm678_vm2, %v703_v30, %v704_v38  ;;  %v3878_v2 = vcombine.low %v265_v53, %v266_v54  ;;  %v271_v20 = vld [vmem:[%s3732_s23 + $0xb4] sm:$0xf] }
  0x31   : > { %v545_v49 = vsel %vm425_vm4, %v540_v41, %v544_v36  ;;  %v559_v55 = vshrl.u32 %v3865_v47, 16  ;;  %v561_v56 = vshll.u32 %v3865_v47, 16  ;;  %v556_v60 = vrot.slane %v554_v46, 1 }
  0x32   : > { %v552_v59 = vor.u32 %v551_v52, %v547_v42  ;;  %v566_v61 = vshll.u32 %v3304_v48, 16  ;;  %v708_v0 = vsel %vm678_vm2, %v706_v39, %v707_v45  ;;  %v709_v8 = vrot.slane %v3855_v31, 1 }
  0x33   : > { %v563_v1 = vrot.slane %v561_v56, 1  ;;  %v3883_v9 = vcombine.low %v267_v57, %v267_v57  ;;  %v710_v11 = vrot.slane %v3303_v40, 1  ;;  %v712_v12 = vrot.slane %v3865_v47, 1  ;;  %v269_v40 = vld [vmem:[%s3732_s23 + $0xac] sm:$0xf] }
  0x34   : > { %658 = vrot.lane.b32.xlu0 %v533_v33, %s3682_s25  ;;  %660 = vrot.lane.b32.xlu1 %v545_v49, %s3682_s25  ;;  %v568_v7 = vrot.slane %v566_v61, 1  ;;  %v585_v15 = vshll.u32 %v3878_v2, 16  ;;  %v557_v16 = vsel %vm425_vm4, %v552_v59, %v556_v60  ;;  %v713_v17 = vrot.slane %v3304_v48, 1  ;;  %v270_v33 = vld [vmem:[%s3732_s23 + $0xb0] sm:$0x1] }
  0x35   : > { %v564_v10 = vor.u32 %v563_v1, %v559_v55  ;;  %v3890_v18 = vcombine.low %v262_v62, %v263_v5  ;;  %v3305_v19 = vcombine.low %v264_v6, %v264_v6  ;;  %v583_v4 = vshrl.u32 %v3878_v2, 16  ;;  %v3926_v1 = vld [vmem:[%s3732_s23] sm:$0xff]  }
  0x36   : > { %v587_v22 = vrot.slane %v585_v15, 1  ;;  %v590_v23 = vshll.u32 %v3883_v9, 16  ;;  %v711_v35 = vsel %vm678_vm2, %v709_v8, %v710_v11  ;;  %v714_v36 = vsel %vm678_vm2, %v712_v12, %v713_v17  ;;  %v274_v6 = vld [vmem:[%s3732_s23 + $0xc0] sm:$0xf] }
  0x37   : > { %v569_v21 = vsel %vm425_vm4, %v564_v10, %v568_v7  ;;  %v571_v25 = vshrl.u32 %v3890_v18, 16  ;;  %v573_v26 = vshll.u32 %v3890_v18, 16  ;;  %v578_v30 = vshll.u32 %v3305_v19, 16  ;;  %v275_v7 = vld [vmem:[%s3732_s23 + $0xc4] sm:$0xf] }
  0x38   : > { %749 = vrot.lane.b32.xlu0 %v705_v58, %s3681_s24  ;;  %751 = vrot.lane.b32.xlu1 %v708_v0, %s3681_s24  ;;  %v3905_v39 = vcombine.low %v271_v20, %v272_v24  ;;  %v588_v41 = vor.u32 %v587_v22, %v583_v4  ;;  %v592_v42 = vrot.slane %v590_v23, 1  ;;  %v3909_v45 = vcombine.low %v273_v28, %v273_v28  ;;  %v276_v10 = vld [vmem:[%s3732_s23 + $0xc8] sm:$0x1]  ;;  %v3940_v4 = vld [vmem:[%s3732_s23 + $0xcc] sm:$0xff]  }
  0x39   : > { %v575_v38 = vrot.slane %v573_v26, 1  ;;  %v580_v43 = vrot.slane %v578_v30, 1  ;;  %v718_v48 = vrot.slane %v3878_v2, 1  ;;  %v715_v52 = vrot.slane %v3890_v18, 1 }
  0x3a   : > { %v609_v49 = vshll.u32 %v3905_v39, 16  ;;  %v716_v53 = vrot.slane %v3305_v19, 1  ;;  %v3915_v54 = vcombine.low %v268_v34, %v269_v40  ;;  %v3307_v55 = vcombine.low %v270_v33, %v270_v33  ;;  %v3614_v19 = vld [vmem:[%s3732_s23 + $0x8] ss:$0 sps:$4 sm:$0x11]  }
  0x3b   : > { %v576_v46 = vor.u32 %v575_v38, %v571_v25  ;;  %v607_v57 = vshrl.u32 %v3905_v39, 16  ;;  %v614_v59 = vshll.u32 %v3909_v45, 16  ;;  %v593_v60 = vsel %vm425_vm4, %v588_v41, %v592_v42  ;;  %v3618_v40 = vld [vmem:[%s3732_s23 + $0xd4] ss:$0 sps:$4 sm:$0x11]  }
  0x3c   : > { %662 = vrot.lane.b32.xlu0 %v557_v16, %s3682_s25  ;;  %664 = vrot.lane.b32.xlu1 %v569_v21, %s3682_s25  ;;  %v611_v58 = vrot.slane %v609_v49, 1  ;;  %v719_v61 = vrot.slane %v3883_v9, 1  ;;  %v595_v62 = vshrl.u32 %v3915_v54, 16  ;;  %v597_v0 = vshll.u32 %v3915_v54, 16 }
  0x3d   : > { %v581_v56 = vsel %vm425_vm4, %v576_v46, %v580_v43  ;;  %v602_v5 = vshll.u32 %v3307_v55, 16  ;;  %v717_v11 = vsel %vm678_vm2, %v715_v52, %v716_v53  ;;  %v616_v12 = vrot.slane %v614_v59, 1 }
  0x3e   : > { %v599_v8 = vrot.slane %v597_v0, 1  ;;  %v612_v9 = vor.u32 %v611_v58, %v607_v57  ;;  %v720_v16 = vsel %vm678_vm2, %v718_v48, %v719_v61  ;;  %v429_v20 = vshll.u32 %v3926_v1, 16 }
  0x3f   : > { %v604_v15 = vrot.slane %v602_v5, 1  ;;  %v3937_v21 = vcombine.low %v274_v6, %v275_v7  ;;  %v724_v22 = vrot.slane %v3905_v39, 1  ;;  %v725_v23 = vrot.slane %v3909_v45, 1 }
  0x40   : > { %753 = vrot.lane.b32.xlu0 %v711_v35, %s3681_s24  ;;  %755 = vrot.lane.b32.xlu1 %v714_v36, %s3681_s24  ;;  %v600_v17 = vor.u32 %v599_v8, %v595_v62  ;;  %v3309_v24 = vcombine.low %v276_v10, %v276_v10  ;;  %v721_v25 = vrot.slane %v3915_v54, 1  ;;  %v722_v26 = vrot.slane %v3307_v55, 1  ;;  %v3619_v8 = vld [vmem:[%s5226_s1 + $0x10] ss:$0 sps:$4 sm:$0x33]  }
  0x41   : > { %v427_v28 = vshrl.u32 %v3926_v1, 16  ;;  %v621_v30 = vshll.u32 %v3937_v21, 16  ;;  %v617_v34 = vsel %vm425_vm4, %v612_v9, %v616_v12  ;;  %v619_v36 = vshrl.u32 %v3937_v21, 16  ;;  %3563 = vmatprep.subr.msk.bf16.mxu0 %vm1043_vm5, %v3619_v8  ;;  %3564 = vmatprep.subr.msk.bf16.mxu1 %vm1043_vm5, %v3619_v8 }
  0x42   : > { %v605_v35 = vsel %vm425_vm4, %v600_v17, %v604_v15  ;;  %v626_v38 = vshll.u32 %v3309_v24, 16  ;;  %v431_v33 = vrot.slane %v429_v20, 1  ;;  %v434_v41 = vshll.u32 %v3614_v19, 16 }
  0x43   : > { %v623_v42 = vrot.slane %v621_v30, 1  ;;  %v633_v43 = vshll.u32 %v3940_v4, 16  ;;  %v723_v45 = vsel %vm678_vm2, %v721_v25, %v722_v26  ;;  %v631_v46 = vshrl.u32 %v3940_v4, 16 }
  0x44   : > { %666 = vrot.lane.b32.xlu0 %v581_v56, %s3682_s25  ;;  %668 = vrot.lane.b32.xlu1 %v593_v60, %s3682_s25  ;;  %v628_v49 = vrot.slane %v626_v38, 1  ;;  %v638_v53 = vshll.u32 %v3618_v40, 16  ;;  %v726_v55 = vsel %vm678_vm2, %v724_v22, %v725_v23  ;;  %v432_v56 = vor.u32 %v431_v33, %v427_v28  ;;  %v3621_v22 = vld [vmem:[%s5226_s1] sm:$0xff]  }
  0x45   : > { %v624_v48 = vor.u32 %v623_v42, %v619_v36  ;;  %v635_v52 = vrot.slane %v633_v43, 1  ;;  %v436_v57 = vrot.slane %v434_v41, 1  ;;  %v727_v62 = vrot.slane %v3937_v21, 1 }
  0x46   : > { %v640_v60 = vrot.slane %v638_v53, 1  ;;  %v728_v0 = vrot.slane %v3309_v24, 1  ;;  %v679_v6 = vrot.slane %v3926_v1, 1  ;;  %v680_v7 = vrot.slane %v3614_v19, 1  ;;  %v3620_v19 = vld [vmem:[%s5226_s1 + $0x8] sm:$0xff]  }
  0x47   : > { %v629_v58 = vsel %vm425_vm4, %v624_v48, %v628_v49  ;;  %v636_v59 = vor.u32 %v635_v52, %v631_v46  ;;  %v437_v61 = vsel %vm425_vm4, %v432_v56, %v436_v57  ;;  %v731_v9 = vrot.slane %v3618_v40, 1 }
  0x48   : > { %757 = vrot.lane.b32.xlu0 %v717_v11, %s3681_s24  ;;  %759 = vrot.lane.b32.xlu1 %v720_v16, %s3681_s24  ;;  %v729_v10 = vsel %vm678_vm2, %v727_v62, %v728_v0  ;;  %v730_v11 = vrot.slane %v3940_v4, 1  ;;  %v1045_v12 = vsel %vm1043_vm5, %v3619_v8, 0  ;;  %v681_v15 = vsel %vm678_vm2, %v679_v6, %v680_v7 }
  0x49   : > { %v641_v5 = vsel %vm425_vm4, %v636_v59, %v640_v60  ;;  %3444 = vmatpush3.bf16.msra.mxu0 %v1045_v12  ;;  %3560 = vmatpush3.bf16.msra.mxu1 %v1045_v12  ;;  %vm2126_vm1 = vcmask 588800  }
  0x4a   : > { %v732_v16 = vsel %vm678_vm2, %v730_v11, %v731_v9  ;;  %3445 = vmatprep.subr.bf16.mxu0 %v3620_v19  ;;  %3558 = vmatprep.subr.bf16.mxu1 %v3620_v19 }
  0x4c   : > { %670 = vrot.lane.b32.xlu0 %v605_v35, %s3682_s25  ;;  %672 = vrot.lane.b32.xlu1 %v617_v34, %s3682_s25 }
  0x4d   : > { %3446 = vmatpush3.bf16.msra.mxu0 %v3620_v19  ;;  %3561 = vmatpush3.bf16.msra.mxu1 %v3620_v19 }
  0x4e   : > { %3447 = vmatprep.subr.bf16.mxu0 %v3621_v22  ;;  %3559 = vmatprep.subr.bf16.mxu1 %v3621_v22 }
  0x50   : > { %761 = vrot.lane.b32.xlu0 %v723_v45, %s3681_s24  ;;  %763 = vrot.lane.b32.xlu1 %v726_v55, %s3681_s24 }
  0x51   : > { %3448 = vmatpush3.bf16.msra.mxu0 %v3621_v22  ;;  %3562 = vmatpush3.bf16.msra.mxu1 %v3621_v22 }
  0x54   : > { %674 = vrot.lane.b32.xlu0 %v629_v58, %s3682_s25  ;;  %642 = vrot.lane.b32.xlu1 %v437_v61, %s3682_s25 }
  0x58   : > { %676 = vrot.lane.b32.xlu0 %v641_v5, %s3682_s25  ;;  %765 = vrot.lane.b32.xlu1 %v729_v10, %s3681_s24  ;;  %s3687_s25 = smov 48  }
  0x5c   : > { %733 = vrot.lane.b32.xlu0 %v681_v15, %s3681_s24  ;;  %767 = vrot.lane.b32.xlu1 %v732_v16, %s3681_s24 }
  0x87   : > { %v738_v17 = vpop.permute.xlu0 %737 }
  0x8a   : > { %v736_v20 = vpop.permute.xlu1 %735 }
  0x8c   : > { %v742_v23 = vpop.permute.xlu0 %741 }
  0x8e   : > { %v740_v24 = vpop.permute.xlu1 %739 }
  0x92   : > { %v744_v25 = vpop.permute.xlu1 %743  ;;  %v645_v26 = vpop.permute.xlu0 %644 }
  0x93   : > { %v773_v28 = vsel %vm769_vm6, %v3744_v13, %v645_v26 }
  0x94   : > { %v3991_v30 = vsel %vm806_vm7, %v773_v28, %v736_v20 }
  0x95   : > { %859 = vrot.lane.b32.xlu0 %v3991_v30, %s3683_s7 }
  0x96   : > { %v649_v34 = vpop.permute.xlu1 %648  ;;  %v647_v35 = vpop.permute.xlu0 %646 }
  0x97   : > { %v775_v36 = vsel %vm769_vm6, %v3737_v3, %v647_v35  ;;  %v777_v40 = vsel %vm769_vm6, %v3767_v37, %v649_v34 }
  0x98   : > { %v3998_v38 = vsel %vm806_vm7, %v775_v36, %v738_v17  ;;  %v4007_v41 = vsel %vm806_vm7, %v777_v40, %v740_v24 }
  0x99   : > { %892 = vrot.lane.b32.xlu0 %v3998_v38, %s3684_s8  ;;  %861 = vrot.lane.b32.xlu1 %v3998_v38, %s3683_s7 }
  0x9a   : > { %v651_v13 = vpop.permute.xlu0 %650  ;;  %v653_v33 = vpop.permute.xlu1 %652 }
  0x9b   : > { %v779_v3 = vsel %vm769_vm6, %v3761_v32, %v651_v13  ;;  %v781_v45 = vsel %vm769_vm6, %v3782_v50, %v653_v33 }
  0x9c   : > { %v4016_v43 = vsel %vm806_vm7, %v779_v3, %v742_v23  ;;  %v4025_v48 = vsel %vm806_vm7, %v781_v45, %v744_v25 }
  0x9d   : > { %863 = vrot.lane.b32.xlu0 %v4007_v41, %s3683_s7  ;;  %894 = vrot.lane.b32.xlu1 %v4007_v41, %s3684_s8 }
  0x9e   : > { %v655_v37 = vpop.permute.xlu0 %654  ;;  %v657_v42 = vpop.permute.xlu1 %656 }
  0x9f   : > { %v783_v49 = vsel %vm769_vm6, %v3810_v27, %v655_v37  ;;  %v785_v55 = vsel %vm769_vm6, %v3821_v44, %v657_v42 }
  0xa1   : > { %896 = vrot.lane.b32.xlu0 %v4016_v43, %s3684_s8  ;;  %865 = vrot.lane.b32.xlu1 %v4016_v43, %s3683_s7 }
  0xa2   : > { %v746_v32 = vpop.permute.xlu0 %745  ;;  %v748_v46 = vpop.permute.xlu1 %747 }
  0xa3   : > { %v4034_v53 = vsel %vm806_vm7, %v783_v49, %v746_v32  ;;  %v4043_v57 = vsel %vm806_vm7, %v785_v55, %v748_v46 }
  0xa5   : > { %867 = vrot.lane.b32.xlu0 %v4025_v48, %s3683_s7  ;;  %898 = vrot.lane.b32.xlu1 %v4025_v48, %s3684_s8 }
  0xa6   : > { %v659_v50 = vpop.permute.xlu0 %658  ;;  %v661_v52 = vpop.permute.xlu1 %660 }
  0xa7   : > { %v787_v58 = vsel %vm769_vm6, %v3834_v63, %v659_v50  ;;  %v789_v61 = vsel %vm769_vm6, %v3842_v14, %v661_v52 }
  0xa9   : > { %900 = vrot.lane.b32.xlu0 %v4034_v53, %s3684_s8  ;;  %869 = vrot.lane.b32.xlu1 %v4034_v53, %s3683_s7 }
  0xaa   : > { %v750_v27 = vpop.permute.xlu0 %749  ;;  %v752_v56 = vpop.permute.xlu1 %751 }
  0xab   : > { %v4052_v60 = vsel %vm806_vm7, %v787_v58, %v750_v27  ;;  %v4061_v0 = vsel %vm806_vm7, %v789_v61, %v752_v56 }
  0xad   : > { %871 = vrot.lane.b32.xlu0 %v4043_v57, %s3683_s7  ;;  %902 = vrot.lane.b32.xlu1 %v4043_v57, %s3684_s8 }
  0xae   : > { %v663_v44 = vpop.permute.xlu0 %662  ;;  %v665_v59 = vpop.permute.xlu1 %664 }
  0xaf   : > { %v791_v5 = vsel %vm769_vm6, %v3855_v31, %v663_v44  ;;  %v793_v8 = vsel %vm769_vm6, %v3865_v47, %v665_v59 }
  0xb1   : > { %904 = vrot.lane.b32.xlu0 %v4052_v60, %s3684_s8  ;;  %873 = vrot.lane.b32.xlu1 %v4052_v60, %s3683_s7 }
  0xb2   : > { %v754_v63 = vpop.permute.xlu0 %753  ;;  %v756_v62 = vpop.permute.xlu1 %755 }
  0xb3   : > { %v4070_v7 = vsel %vm806_vm7, %v791_v5, %v754_v63  ;;  %v4081_v9 = vsel %vm806_vm7, %v793_v8, %v756_v62 }
  0xb5   : > { %875 = vrot.lane.b32.xlu0 %v4061_v0, %s3683_s7  ;;  %906 = vrot.lane.b32.xlu1 %v4061_v0, %s3684_s8 }
  0xb6   : > { %v667_v14 = vpop.permute.xlu0 %666  ;;  %v669_v6 = vpop.permute.xlu1 %668 }
  0xb7   : > { %v795_v10 = vsel %vm769_vm6, %v3890_v18, %v667_v14  ;;  %v797_v15 = vsel %vm769_vm6, %v3878_v2, %v669_v6 }
  0xb9   : > { %908 = vrot.lane.b32.xlu0 %v4070_v7, %s3684_s8  ;;  %877 = vrot.lane.b32.xlu1 %v4070_v7, %s3683_s7 }
  0xba   : > { %v758_v31 = vpop.permute.xlu0 %757  ;;  %v760_v11 = vpop.permute.xlu1 %759 }
  0xbb   : > { %v4088_v47 = vsel %vm806_vm7, %v795_v10, %v758_v31  ;;  %v4097_v18 = vsel %vm806_vm7, %v797_v15, %v760_v11 }
  0xbd   : > { %879 = vrot.lane.b32.xlu0 %v4081_v9, %s3683_s7  ;;  %910 = vrot.lane.b32.xlu1 %v4081_v9, %s3684_s8 }
  0xbe   : > { %v671_v12 = vpop.permute.xlu0 %670  ;;  %v673_v16 = vpop.permute.xlu1 %672 }
  0xbf   : > { %v799_v19 = vsel %vm769_vm6, %v3915_v54, %v671_v12  ;;  %v801_v23 = vsel %vm769_vm6, %v3905_v39, %v673_v16 }
  0xc1   : > { %912 = vrot.lane.b32.xlu0 %v4088_v47, %s3684_s8  ;;  %881 = vrot.lane.b32.xlu1 %v4088_v47, %s3683_s7 }
  0xc2   : > { %v762_v17 = vpop.permute.xlu0 %761  ;;  %v764_v20 = vpop.permute.xlu1 %763 }
  0xc3   : > { %v4106_v2 = vsel %vm806_vm7, %v799_v19, %v762_v17  ;;  %v4115_v54 = vsel %vm806_vm7, %v801_v23, %v764_v20 }
  0xc5   : > { %883 = vrot.lane.b32.xlu0 %v4097_v18, %s3683_s7  ;;  %914 = vrot.lane.b32.xlu1 %v4097_v18, %s3684_s8 }
  0xc6   : > { %v675_v22 = vpop.permute.xlu0 %674  ;;  %v643_v24 = vpop.permute.xlu1 %642 }
  0xc7   : > { %v803_v25 = vsel %vm769_vm6, %v3937_v21, %v675_v22  ;;  %v771_v40 = vsel %vm769_vm6, %v3926_v1, %v643_v24 }
  0xc9   : > { %916 = vrot.lane.b32.xlu0 %v4106_v2, %s3684_s8  ;;  %885 = vrot.lane.b32.xlu1 %v4106_v2, %s3683_s7 }
  0xca   : > { %v766_v26 = vpop.permute.xlu1 %765  ;;  %v677_v28 = vpop.permute.xlu0 %676 }
  0xcb   : > { %v840_v39 = vsel %vm806_vm7, %v803_v25, %v766_v26  ;;  %v805_v34 = vsel %vm769_vm6, %v3940_v4, %v677_v28 }
  0xcd   : > { %887 = vrot.lane.b32.xlu0 %v4115_v54, %s3683_s7  ;;  %918 = vrot.lane.b32.xlu1 %v4115_v54, %s3684_s8 }
  0xce   : > { %v768_v35 = vpop.permute.xlu1 %767  ;;  %v734_v36 = vpop.permute.xlu0 %733 }
  0xcf   : > { %v842_v21 = vsel %vm806_vm7, %v805_v34, %v768_v35  ;;  %v808_v33 = vsel %vm806_vm7, %v771_v40, %v734_v36 }
  0xd1   : > { %920 = vrot.lane.b32.xlu0 %v840_v39, %s3684_s8  ;;  %889 = vrot.lane.b32.xlu1 %v840_v39, %s3683_s7 }
  0xd5   : > { %922 = vrot.lane.b32.xlu1 %v842_v21, %s3684_s8 }
 0x107   : > { %v860_v13 = vpop.permute.xlu0 %859 }
 0x108   : > { %v926_v4 = vsel %vm924_vm8, %v808_v33, %v860_v13 }
 0x10b   : > { %v893_v3 = vpop.permute.xlu0 %892  ;;  %v862_v37 = vpop.permute.xlu1 %861 }
 0x10c   : > { %v959_v42 = vsel %vm957_vm9, %v926_v4, %v893_v3  ;;  %v928_v45 = vsel %vm924_vm8, %v3991_v30, %v862_v37 }
 0x10d   : > { %3449 = vmatprep.mubr.msk.bf16.mxu0 %vm1010_vm10, %v959_v42  ;;  %v1208_v42 = vlaneseq }
 0x10f   : > { %v864_v32 = vpop.permute.xlu0 %863  ;;  %v895_v46 = vpop.permute.xlu1 %894 }
 0x110   : > { %v961_v1 = vsel %vm957_vm9, %v928_v45, %v895_v46  ;;  %v930_v49 = vsel %vm924_vm8, %v3998_v38, %v864_v32  ;;  %v4196_v45 = vshrl.u32 %v1208_v42, 7 }
 0x111   : > { %3450 = vmatmul.mubr.msk.bf16.vlgmr.msra.gmra.mxu0 %vm1010_vm10, %v961_v1 }
 0x112   : > { %v1210_v32 = vsub.s32 0, %v4196_v45  ;;  %v1246_v1 = vsub.s32 1, %v4196_v45 }
 0x113   : > { %v897_v50 = vpop.permute.xlu0 %896  ;;  %v866_v52 = vpop.permute.xlu1 %865 }
 0x114   : > { %v963_v55 = vsel %vm957_vm9, %v930_v49, %v897_v50  ;;  %v932_v27 = vsel %vm924_vm8, %v4007_v41, %v866_v52 }
 0x115   : > { %3453 = vmatprep.mubr.msk.bf16.mxu0 %vm1010_vm10, %v963_v55 }
 0x117   : > { %v868_v56 = vpop.permute.xlu0 %867  ;;  %v899_v30 = vpop.permute.xlu1 %898 }
 0x118   : > { %v965_v58 = vsel %vm957_vm9, %v932_v27, %v899_v30  ;;  %v934_v44 = vsel %vm924_vm8, %v4016_v43, %v868_v56 }
 0x119   : > { %3454 = vmatmul.mubr.msk.bf16.gmra.mxu0 %vm1010_vm10, %v965_v58 }
 0x11b   : > { %v901_v59 = vpop.permute.xlu0 %900  ;;  %v870_v38 = vpop.permute.xlu1 %869 }
 0x11c   : > { %v967_v61 = vsel %vm957_vm9, %v934_v44, %v901_v59  ;;  %v936_v63 = vsel %vm924_vm8, %v4025_v48, %v870_v38 }
 0x11d   : > { %3457 = vmatprep.mubr.msk.bf16.mxu0 %vm1010_vm10, %v967_v61 }
 0x11f   : > { %v872_v62 = vpop.permute.xlu0 %871  ;;  %v903_v41 = vpop.permute.xlu1 %902 }
 0x120   : > { %v969_v5 = vsel %vm957_vm9, %v936_v63, %v903_v41  ;;  %v938_v14 = vsel %vm924_vm8, %v4034_v53, %v872_v62 }
 0x121   : > { %3458 = vmatmul.mubr.msk.bf16.gmra.mxu0 %vm1010_vm10, %v969_v5 }
 0x123   : > { %v905_v6 = vpop.permute.xlu0 %904  ;;  %v874_v43 = vpop.permute.xlu1 %873 }
 0x124   : > { %v971_v8 = vsel %vm957_vm9, %v938_v14, %v905_v6  ;;  %v940_v31 = vsel %vm924_vm8, %v4043_v57, %v874_v43 }
 0x125   : > { %3461 = vmatprep.mubr.msk.bf16.mxu0 %vm1010_vm10, %v971_v8 }
 0x127   : > { %v876_v10 = vpop.permute.xlu0 %875  ;;  %v907_v48 = vpop.permute.xlu1 %906 }
 0x128   : > { %v973_v11 = vsel %vm957_vm9, %v940_v31, %v907_v48  ;;  %v942_v12 = vsel %vm924_vm8, %v4052_v60, %v876_v10 }
 0x129   : > { %3462 = vmatmul.mubr.msk.bf16.gmra.mxu0 %vm1010_vm10, %v973_v11 }
 0x12b   : > { %v909_v15 = vpop.permute.xlu0 %908  ;;  %v878_v53 = vpop.permute.xlu1 %877 }
 0x12c   : > { %v975_v16 = vsel %vm957_vm9, %v942_v12, %v909_v15  ;;  %v944_v17 = vsel %vm924_vm8, %v4061_v0, %v878_v53 }
 0x12d   : > { %3465 = vmatprep.mubr.msk.bf16.mxu1 %vm1010_vm10, %v975_v16 }
 0x12f   : > { %v880_v19 = vpop.permute.xlu0 %879  ;;  %v911_v57 = vpop.permute.xlu1 %910 }
 0x130   : > { %v977_v20 = vsel %vm957_vm9, %v944_v17, %v911_v57  ;;  %v946_v22 = vsel %vm924_vm8, %v4070_v7, %v880_v19 }
 0x131   : > { %3466 = vmatmul.mubr.msk.bf16.vlgmr.msra.gmra.mxu1 %vm1010_vm10, %v977_v20 }
 0x133   : > { %v913_v23 = vpop.permute.xlu0 %912  ;;  %v882_v60 = vpop.permute.xlu1 %881 }
 0x134   : > { %v979_v24 = vsel %vm957_vm9, %v946_v22, %v913_v23  ;;  %v948_v25 = vsel %vm924_vm8, %v4081_v9, %v882_v60 }
 0x135   : > { %3469 = vmatprep.mubr.msk.bf16.mxu1 %vm1010_vm10, %v979_v24 }
 0x137   : > { %v884_v26 = vpop.permute.xlu0 %883  ;;  %v915_v0 = vpop.permute.xlu1 %914 }
 0x138   : > { %v981_v28 = vsel %vm957_vm9, %v948_v25, %v915_v0  ;;  %v950_v39 = vsel %vm924_vm8, %v4088_v47, %v884_v26 }
 0x139   : > { %3470 = vmatmul.mubr.msk.bf16.gmra.mxu1 %vm1010_vm10, %v981_v28 }
 0x13b   : > { %v917_v34 = vpop.permute.xlu0 %916  ;;  %v886_v7 = vpop.permute.xlu1 %885 }
 0x13c   : > { %v983_v35 = vsel %vm957_vm9, %v950_v39, %v917_v34  ;;  %v952_v21 = vsel %vm924_vm8, %v4097_v18, %v886_v7 }
 0x13d   : > { %3473 = vmatprep.mubr.msk.bf16.mxu1 %vm1010_vm10, %v983_v35 }
 0x13f   : > { %v888_v36 = vpop.permute.xlu0 %887  ;;  %v919_v9 = vpop.permute.xlu1 %918 }
 0x140   : > { %v985_v40 = vsel %vm957_vm9, %v952_v21, %v919_v9  ;;  %v954_v13 = vsel %vm924_vm8, %v4106_v2, %v888_v36  ;;  %v280_v2 = vld [vmem:[%s5228_s3] sm:$0x3f] }
 0x141   : > { %3474 = vmatmul.mubr.msk.bf16.gmra.mxu1 %vm1010_vm10, %v985_v40  ;;  %v4202_v46 = vrot.slane %v280_v2, %v1210_v32  ;;  %v4206_v50 = vrot.slane %v280_v2, %v1246_v1 }
 0x143   : > { %v921_v33 = vpop.permute.xlu0 %920  ;;  %v890_v47 = vpop.permute.xlu1 %889 }
 0x144   : > { %v987_v4 = vsel %vm957_vm9, %v954_v13, %v921_v33  ;;  %v956_v3 = vsel %vm924_vm8, %v4115_v54, %v890_v47 }
 0x145   : > { %3477 = vmatprep.mubr.msk.bf16.mxu1 %vm1010_vm10, %v987_v4 }
 0x147   : > { %v923_v37 = vpop.permute.xlu1 %922 }
 0x148   : > { %v989_v18 = vsel %vm957_vm9, %v956_v3, %v923_v37 }
 0x149   : > { %3478 = vmatmul.mubr.msk.bf16.gmra.mxu1 %vm1010_vm10, %v989_v18 }
 0x1d1   : > { %v3451_v49 = vpop.f32.mrf.mxu0 }
 0x1d2   : > { %v1214_v54 = vmul.f32 %v3451_v49, %v4202_v46 }
 0x1d3   : > { %v1081_v52 = vpop.f32.mrf.mxu0 }
 0x1d4   : > { %v1212_v55 = vmul.f32 %v4202_v46, %v1081_v52  ;;  %v1250_v56 = vadd.f32 %v4206_v50, %v1214_v54 }
 0x1d5   : > { %v3452_v27 = vpop.f32.mrf.mxu0 }
 0x1d6   : > { %v1215_v30 = vmul.f32 %v3452_v27, %v4202_v46  ;;  %v1248_v44 = vadd.f32 %v4206_v50, %v1212_v55  ;;  %v1282_v63 = vmax.f32 %v1250_v56, 0.0 }
 0x1d7   : > { %v1084_v58 = vpop.f32.mrf.mxu0 }
 0x1d8   : > { %v1251_v59 = vadd.f32 %v4206_v50, %v1215_v30  ;;  %v1213_v38 = vmul.f32 %v4202_v46, %v1084_v58  ;;  %v1280_v6 = vmax.f32 %v1248_v44, 0.0 }
 0x1d9   : > { %v3455_v61 = vpop.f32.mrf.mxu0 }
 0x1da   : > { %v1283_v62 = vmax.f32 %v1251_v59, 0.0  ;;  %v1249_v41 = vadd.f32 %v4206_v50, %v1213_v38  ;;  %v1218_v5 = vmul.f32 %v3455_v61, %v4202_v46 }
 0x1db   : > { %v1097_v14 = vpop.f32.mrf.mxu0 }
 0x1dc   : > { %v1313_v43 = vpack.c.bf16 %v1283_v62, %v1282_v63  ;;  %v1281_v8 = vmax.f32 %v1249_v41, 0.0  ;;  %v1254_v11 = vadd.f32 %v4206_v50, %v1218_v5  ;;  %v1216_v23 = vmul.f32 %v4202_v46, %v1097_v14 }
 0x1dd   : > { %v3456_v31 = vpop.f32.mrf.mxu0 }
 0x1de   : > { %v1343_v10 = vshrl.u32 %v1313_v43, 16  ;;  %v1312_v48 = vpack.c.bf16 %v1281_v8, %v1280_v6  ;;  %v1219_v12 = vmul.f32 %v3456_v31, %v4202_v46  ;;  %v1346_v16 = vshll.u32 %v1313_v43, 16 }
 0x1df   : > { %v1100_v15 = vpop.f32.mrf.mxu0  ;;  %v1286_v25 = vmax.f32 %v1254_v11, 0.0  ;;  %v1252_v36 = vadd.f32 %v4206_v50, %v1216_v23 }
 0x1e0   : > { %v1345_v53 = vrot.slane %v1343_v10, 7  ;;  %v1336_v17 = vshrl.u32 %v1312_v48, 16  ;;  %v1255_v19 = vadd.f32 %v4206_v50, %v1219_v12  ;;  %v1217_v60 = vmul.f32 %v4202_v46, %v1100_v15 }
 0x1e1   : > { %v3459_v57 = vpop.f32.mrf.mxu0  ;;  %v1339_v34 = vshll.u32 %v1312_v48, 16  ;;  %v1284_v49 = vmax.f32 %v1252_v36, 0.0 }
 0x1e2   : > { %v1348_v22 = vor.u32 %v1346_v16, %v1345_v53  ;;  %v1338_v24 = vrot.slane %v1336_v17, 7  ;;  %v1287_v26 = vmax.f32 %v1255_v19, 0.0  ;;  %v1222_v0 = vmul.f32 %v3459_v57, %v4202_v46 }
 0x1e3   : > { %v1113_v28 = vpop.f32.mrf.mxu0  ;;  %v1503_v39 = vsel %vm4219_vm13, %v1345_v53, 0  ;;  %v1253_v9 = vadd.f32 %v4206_v50, %v1217_v60 }
 0x1e4   : > { %v1315_v7 = vpack.c.bf16 %v1287_v26, %v1286_v25  ;;  %v4230_v21 = vsel %vm4219_vm13, 0, %v1348_v22  ;;  %v1341_v13 = vor.u32 %v1339_v34, %v1338_v24  ;;  %v1258_v33 = vadd.f32 %v4206_v50, %v1222_v0 }
 0x1e5   : > { %v3460_v35 = vpop.f32.mrf.mxu0  ;;  %v1796_v4 = vrot.slane %v4230_v21, 1  ;;  %v1797_v3 = vrot.slane %v1503_v39, 1  ;;  %v1550_v42 = vshll.u32 %v1503_v39, 16  ;;  %v1545_v1 = vshll.u32 %v4230_v21, 16 }
 0x1e6   : > { %v1223_v40 = vmul.f32 %v3460_v35, %v4202_v46  ;;  %v1357_v37 = vshrl.u32 %v1315_v7, 16  ;;  %v1285_v54 = vmax.f32 %v1253_v9, 0.0  ;;  %v1290_v55 = vmax.f32 %v1258_v33, 0.0 }
 0x1e7   : > { %v1116_v47 = vpop.f32.mrf.mxu0  ;;  %v1798_v32 = vsel %vm678_vm2, %v1796_v4, %v1797_v3  ;;  %v1543_v56 = vshrl.u32 %v4230_v21, 16  ;;  %v1547_v30 = vrot.slane %v1545_v1, 1  ;;  %v4244_v58 = vsel %vm4219_vm13, 0, %v1341_v13 }
 0x1e8   : > { %v1259_v18 = vadd.f32 %v4206_v50, %v1223_v40  ;;  %1845 = vrot.lane.b32.xlu0 %v1798_v32, %s3685_s11  ;;  %v1359_v44 = vrot.slane %v1357_v37, 7  ;;  %v1220_v59 = vmul.f32 %v4202_v46, %v1113_v28  ;;  %v1552_v61 = vrot.slane %v1550_v42, 1 }
 0x1e9   : > { %v3463_v2 = vpop.f32.mrf.mxu0  ;;  %v1548_v62 = vor.u32 %v1547_v30, %v1543_v56  ;;  %v1502_v41 = vsel %vm4219_vm13, %v1338_v24, 0  ;;  %v1793_v5 = vrot.slane %v4244_v58, 1  ;;  %v1360_v6 = vshll.u32 %v1315_v7, 16 }
 0x1ea   : > { %v1291_v52 = vmax.f32 %v1259_v18, 0.0  ;;  %v1226_v38 = vmul.f32 %v3463_v2, %v4202_v46  ;;  %v4251_v43 = vpack.c.bf16 %v1285_v54, %v1284_v49  ;;  %v1794_v31 = vrot.slane %v1502_v41, 1 }
 0x1eb   : > { %v1129_v27 = vpop.f32.mrf.mxu0  ;;  %v1553_v8 = vsel %vm425_vm4, %v1548_v62, %v1552_v61  ;;  %v1362_v48 = vor.u32 %v1360_v6, %v1359_v44  ;;  %v4256_v11 = vadd.f32 %v4206_v50, %v1220_v59  ;;  %v1221_v12 = vmul.f32 %v4202_v46, %v1116_v47 }
 0x1ec   : > { %v1317_v63 = vpack.c.bf16 %v1291_v52, %v1290_v55  ;;  %1726 = vrot.lane.b32.xlu1 %v1553_v8, %s3681_s24  ;;  %v1262_v53 = vadd.f32 %v4206_v50, %v1226_v38  ;;  %v1795_v16 = vsel %vm678_vm2, %v1793_v5, %v1794_v31  ;;  %v1350_v57 = vshrl.u32 %v4251_v43, 16 }
 0x1ed   : > { %v3464_v14 = vpop.f32.mrf.mxu0  ;;  %1843 = vrot.lane.b32.xlu0 %v1795_v16, %s3685_s11  ;;  %v1533_v22 = vshll.u32 %v4244_v58, 16  ;;  %v1538_v23 = vshll.u32 %v1502_v41, 16  ;;  %v1353_v60 = vshll.u32 %v4251_v43, 16  ;;  %v1288_v28 = vmax.f32 %v4256_v11, 0.0 }
 0x1ee   : > { %v1227_v10 = vmul.f32 %v3464_v14, %v4202_v46  ;;  %v1371_v15 = vshrl.u32 %v1317_v63, 16  ;;  %v1531_v39 = vshrl.u32 %v4244_v58, 16  ;;  %v1257_v36 = vadd.f32 %v4206_v50, %v1221_v12 }
 0x1ef   : > { %v1132_v25 = vpop.f32.mrf.mxu0  ;;  %v1535_v34 = vrot.slane %v1533_v22, 1  ;;  %v1294_v9 = vmax.f32 %v1262_v53, 0.0  ;;  %v4274_v40 = vsel %vm4219_vm13, 0, %v1362_v48  ;;  %v4276_v33 = vrot.slane %v1350_v57, 7 }
 0x1f0   : > { %v1263_v17 = vadd.f32 %v4206_v50, %v1227_v10  ;;  %v1373_v35 = vrot.slane %v1371_v15, 7  ;;  %v1225_v47 = vmul.f32 %v4202_v46, %v1132_v25  ;;  %v1540_v3 = vrot.slane %v1538_v23, 1 }
 0x1f1   : > { %v3467_v19 = vpop.f32.mrf.mxu1  ;;  %v1536_v4 = vor.u32 %v1535_v34, %v1531_v39  ;;  %v1374_v37 = vshll.u32 %v1317_v63, 16  ;;  %v1505_v32 = vsel %vm4219_vm13, %v1359_v44, 0  ;;  %v1224_v1 = vmul.f32 %v4202_v46, %v1129_v27 }
 0x1f2   : > { %v1295_v24 = vmax.f32 %v1263_v17, 0.0  ;;  %v1230_v26 = vmul.f32 %v3467_v19, %v4202_v46  ;;  %v1802_v52 = vrot.slane %v4274_v40, 1  ;;  %v1289_v56 = vmax.f32 %v1257_v36, 0.0 }
 0x1f3   : > { %v1145_v0 = vpop.f32.mrf.mxu1  ;;  %v1541_v49 = vsel %vm425_vm4, %v1536_v4, %v1540_v3  ;;  %v1376_v55 = vor.u32 %v1374_v37, %v1373_v35  ;;  %v1261_v44 = vadd.f32 %v4206_v50, %v1225_v47  ;;  %v1803_v61 = vrot.slane %v1505_v32, 1 }
 0x1f4   : > { %v1228_v7 = vmul.f32 %v4202_v46, %v1145_v0  ;;  %v1319_v18 = vpack.c.bf16 %v1295_v24, %v1294_v9  ;;  %v1266_v42 = vadd.f32 %v4206_v50, %v1230_v26  ;;  %1724 = vrot.lane.b32.xlu0 %v1541_v49, %s3681_s24  ;;  %v1569_v27 = vshll.u32 %v4274_v40, 16 }
 0x1f5   : > { %v3468_v13 = vpop.f32.mrf.mxu1  ;;  %v1574_v63 = vshll.u32 %v1505_v32, 16  ;;  %v1804_v8 = vsel %vm678_vm2, %v1802_v52, %v1803_v61  ;;  %v1567_v31 = vshrl.u32 %v4274_v40, 16  ;;  %v4299_v15 = vsel %vm4219_vm13, 0, %v1376_v55 }
 0x1f6   : > { %v1264_v54 = vadd.f32 %v4206_v50, %v1228_v7  ;;  %v1231_v30 = vmul.f32 %v3468_v13, %v4202_v46  ;;  %v1385_v62 = vshrl.u32 %v1319_v18, 16  ;;  %v1298_v41 = vmax.f32 %v1266_v42, 0.0 }
 0x1f7   : > { %v1148_v2 = vpop.f32.mrf.mxu1  ;;  %v1571_v10 = vrot.slane %v1569_v27, 1  ;;  %v4302_v16 = vor.u32 %v1353_v60, %v4276_v33  ;;  %v1260_v17 = vadd.f32 %v4206_v50, %v1224_v1  ;;  %v1576_v57 = vrot.slane %v1574_v63, 1 }
 0x1f8   : > { %v1229_v59 = vmul.f32 %v4202_v46, %v1148_v2  ;;  %v1267_v5 = vadd.f32 %v4206_v50, %v1231_v30  ;;  %v1296_v43 = vmax.f32 %v1264_v54, 0.0  ;;  %1849 = vrot.lane.b32.xlu0 %v1804_v8, %s3685_s11  ;;  %v1387_v22 = vrot.slane %v1385_v62, 7 }
 0x1f9   : > { %v3471_v38 = vpop.f32.mrf.mxu1  ;;  %v1572_v19 = vor.u32 %v1571_v10, %v1567_v31  ;;  %v1507_v25 = vsel %vm4219_vm13, %v1373_v35, 0  ;;  %v4307_v0 = vpack.c.bf16 %v1289_v56, %v1288_v28  ;;  %v1808_v34 = vrot.slane %v4299_v15, 1 }
 0x1fa   : > { %v1265_v14 = vadd.f32 %v4206_v50, %v1229_v59  ;;  %v1299_v48 = vmax.f32 %v1267_v5, 0.0  ;;  %v1234_v12 = vmul.f32 %v3471_v38, %v4202_v46  ;;  %v1388_v7 = vshll.u32 %v1319_v18, 16 }
 0x1fb   : > { %v1161_v6 = vpop.f32.mrf.mxu1  ;;  %v1577_v39 = vsel %vm425_vm4, %v1572_v19, %v1576_v57  ;;  %v1293_v36 = vmax.f32 %v1261_v44, 0.0  ;;  %v1809_v3 = vrot.slane %v1507_v25, 1  ;;  %v1292_v37 = vmax.f32 %v1260_v17, 0.0 }
 0x1fc   : > { %v1297_v11 = vmax.f32 %v1265_v14, 0.0  ;;  %v1321_v23 = vpack.c.bf16 %v1299_v48, %v1298_v41  ;;  %1730 = vrot.lane.b32.xlu0 %v1577_v39, %s3681_s24  ;;  %v1270_v13 = vadd.f32 %v4206_v50, %v1234_v12  ;;  %v1390_v42 = vor.u32 %v1388_v7, %v1387_v22 }
 0x1fd   : > { %v3472_v53 = vpop.f32.mrf.mxu1  ;;  %v1593_v32 = vshll.u32 %v4299_v15, 16  ;;  %v1598_v2 = vshll.u32 %v1507_v25, 16  ;;  %v1364_v18 = vshrl.u32 %v4307_v0, 16  ;;  %v1810_v54 = vsel %vm678_vm2, %v1808_v34, %v1809_v3 }
 0x1fe   : > { %v1320_v24 = vpack.c.bf16 %v1297_v11, %v1296_v43  ;;  %v1235_v60 = vmul.f32 %v3472_v53, %v4202_v46  ;;  %v1399_v9 = vshrl.u32 %v1321_v23, 16  ;;  %v4321_v55 = vpack.c.bf16 %v1293_v36, %v1292_v37 }
 0x1ff   : > { %v1164_v26 = vpop.f32.mrf.mxu1  ;;  %v1232_v56 = vmul.f32 %v4202_v46, %v1161_v6  ;;  %v1591_v30 = vshrl.u32 %v4299_v15, 16  ;;  %v1595_v59 = vrot.slane %v1593_v32, 1  ;;  %v1402_v44 = vshll.u32 %v1321_v23, 16 }
 0x200   : > { %v1392_v4 = vshrl.u32 %v1320_v24, 16  ;;  %v1271_v35 = vadd.f32 %v4206_v50, %v1235_v60  ;;  %v1233_v28 = vmul.f32 %v4202_v46, %v1164_v26  ;;  %v1401_v49 = vrot.slane %v1399_v9, 7  ;;  %1853 = vrot.lane.b32.xlu0 %v1810_v54, %s3685_s11 }
 0x201   : > { %v3475_v47 = vpop.f32.mrf.mxu1  ;;  %v1302_v27 = vmax.f32 %v1270_v13, 0.0  ;;  %v1596_v62 = vor.u32 %v1595_v59, %v1591_v30  ;;  %v1600_v41 = vrot.slane %v1598_v2, 1  ;;  %v4332_v14 = vsel %vm4219_vm13, 0, %v1390_v42 }
 0x202   : > { %v1303_v52 = vmax.f32 %v1271_v35, 0.0  ;;  %v4326_v61 = vrot.slane %v1392_v4, 7  ;;  %v1269_v63 = vadd.f32 %v4206_v50, %v1233_v28  ;;  %v1238_v5 = vmul.f32 %v3475_v47, %v4202_v46 }
 0x203   : > { %v4317_v1 = vpop.f32.mrf.mxu1  ;;  %v1367_v43 = vshll.u32 %v4307_v0, 16  ;;  %v1404_v8 = vor.u32 %v1402_v44, %v1401_v49  ;;  %v1395_v31 = vshll.u32 %v1320_v24, 16  ;;  %v4335_v48 = vrot.slane %v1364_v18, 7 }
 0x204   : > { %v1323_v10 = vpack.c.bf16 %v1303_v52, %v1302_v27  ;;  %v1378_v11 = vshrl.u32 %v4321_v55, 16  ;;  %v1601_v12 = vsel %vm425_vm4, %v1596_v62, %v1600_v41  ;;  %v1509_v53 = vsel %vm4219_vm13, %v1387_v22, 0 }
 0x205   : > { %v3476_v38 = vpop.f32.mrf.mxu1  ;;  %v1397_v19 = vor.u32 %v1395_v31, %v4326_v61  ;;  %v1268_v57 = vadd.f32 %v4206_v50, %v1232_v56  ;;  %v1301_v23 = vmax.f32 %v1269_v63, 0.0  ;;  %1734 = vrot.lane.b32.xlu0 %v1601_v12, %s3681_s24  ;;  %v1814_v24 = vrot.slane %v4332_v14, 1 }
 0x206   : > { %v1274_v25 = vadd.f32 %v4206_v50, %v1238_v5  ;;  %v1815_v26 = vrot.slane %v1509_v53, 1  ;;  %v1239_v0 = vmul.f32 %v3476_v38, %v4202_v46  ;;  %v1617_v39 = vshll.u32 %v4332_v14, 16 }
 0x207   : > { %v1180_v6 = vpop.f32.mrf.mxu1  ;;  %v4352_v22 = vsel %vm4219_vm13, 0, %v1404_v8  ;;  %v1413_v60 = vshrl.u32 %v1323_v10, 16  ;;  %v1615_v7 = vshrl.u32 %v4332_v14, 16  ;;  %v1622_v36 = vshll.u32 %v1509_v53, 16 }
 0x208   : > { %v1816_v9 = vsel %vm678_vm2, %v1814_v24, %v1815_v26  ;;  %v1275_v13 = vadd.f32 %v4206_v50, %v1239_v0  ;;  %v1619_v47 = vrot.slane %v1617_v39, 1  ;;  %v4359_v3 = vor.u32 %v1367_v43, %v4335_v48 }
 0x209   : > { %v3479_v17 = vpop.f32.mrf.mxu1  ;;  %v4361_v35 = vrot.slane %v1378_v11, 7  ;;  %v1381_v28 = vshll.u32 %v4321_v55, 16  ;;  %v1300_v37 = vmax.f32 %v1268_v57, 0.0  ;;  %1857 = vrot.lane.b32.xlu0 %v1816_v9, %s3685_s11  ;;  %v1306_v42 = vmax.f32 %v1274_v25, 0.0 }
 0x20a   : > { %v1242_v4 = vmul.f32 %v3479_v17, %v4202_v46  ;;  %v1307_v32 = vmax.f32 %v1275_v13, 0.0  ;;  %v1620_v2 = vor.u32 %v1619_v47, %v1615_v7  ;;  %v1624_v18 = vrot.slane %v1622_v36, 1 }
 0x20b   : > { %v4348_v34 = vpop.f32.mrf.mxu1  ;;  %v4367_v52 = vsel %vm4219_vm13, 0, %v1397_v19  ;;  %v1322_v56 = vpack.c.bf16 %v1301_v23, %v1300_v37  ;;  %v1511_v30 = vsel %vm4219_vm13, %v1401_v49, 0  ;;  %v1641_v59 = vshll.u32 %v4352_v22, 16 }
 0x20c   : > { %v1415_v38 = vrot.slane %v1413_v60, 7  ;;  %v1325_v55 = vpack.c.bf16 %v1307_v32, %v1306_v42  ;;  %v1625_v44 = vsel %vm425_vm4, %v1620_v2, %v1624_v18  ;;  %v1278_v27 = vadd.f32 %v4206_v50, %v1242_v4 }
 0x20d   : > { %v3480_v54 = vpop.f32.mrf.mxu1  ;;  %1738 = vrot.lane.b32.xlu0 %v1625_v44, %s3681_s24  ;;  %v1639_v63 = vshrl.u32 %v4352_v22, 16  ;;  %v1643_v62 = vrot.slane %v1641_v59, 1  ;;  %v1646_v41 = vshll.u32 %v1511_v30, 16  ;;  %v1416_v43 = vshll.u32 %v1323_v10, 16 }
 0x20e   : > { %v1243_v5 = vmul.f32 %v3480_v54, %v4202_v46  ;;  %v1236_v49 = vmul.f32 %v4202_v46, %v4317_v1  ;;  %v1427_v8 = vshrl.u32 %v1325_v55, 16  ;;  %v1237_v31 = vmul.f32 %v4202_v46, %v1180_v6 }
 0x20f   : > { %v1644_v11 = vor.u32 %v1643_v62, %v1639_v63  ;;  %v1648_v12 = vrot.slane %v1646_v41, 1  ;;  %v4384_v17 = vsel %vm4219_vm13, %v4326_v61, 0  ;;  %v4387_v19 = vor.u32 %v1381_v28, %v4361_v35 }
 0x210   : > { %v1279_v53 = vadd.f32 %v4206_v50, %v1243_v5  ;;  %v1418_v57 = vor.u32 %v1416_v43, %v1415_v38  ;;  %v1406_v10 = vshrl.u32 %v1322_v56, 16  ;;  %v1629_v23 = vshll.u32 %v4367_v52, 16 }
 0x211   : > { %v1310_v1 = vmax.f32 %v1278_v27, 0.0  ;;  %v1649_v24 = vsel %vm425_vm4, %v1644_v11, %v1648_v12  ;;  %v1634_v25 = vshll.u32 %v4384_v17, 16  ;;  %v1272_v26 = vadd.f32 %v4206_v50, %v1236_v49 }
 0x212   : > { %v1311_v6 = vmax.f32 %v1279_v53, 0.0  ;;  %1742 = vrot.lane.b32.xlu0 %v1649_v24, %s3681_s24  ;;  %v1627_v61 = vshrl.u32 %v4367_v52, 16  ;;  %v1631_v0 = vrot.slane %v1629_v23, 1  ;;  %v1820_v39 = vrot.slane %v4352_v22, 1 }
 0x213   : > { %v1429_v60 = vrot.slane %v1427_v8, 7  ;;  %v1273_v7 = vadd.f32 %v4206_v50, %v1237_v31  ;;  %v1821_v9 = vrot.slane %v1511_v30, 1  ;;  %v4397_v13 = vrot.slane %v1406_v10, 7 }
 0x214   : > { %v1327_v36 = vpack.c.bf16 %v1311_v6, %v1310_v1  ;;  %v1632_v47 = vor.u32 %v1631_v0, %v1627_v61  ;;  %v1636_v4 = vrot.slane %v1634_v25, 1  ;;  %v4402_v28 = vsel %vm4219_vm13, 0, %v4302_v16 }
 0x215   : > { %v4406_v37 = vsel %vm4219_vm13, 0, %v1418_v57  ;;  %v1430_v42 = vshll.u32 %v1325_v55, 16  ;;  %v1822_v2 = vsel %vm678_vm2, %v1820_v39, %v1821_v9  ;;  %v1504_v54 = vsel %vm4219_vm13, %v4276_v33, 0 }
 0x216   : > { %v1441_v32 = vshrl.u32 %v1327_v36, 16  ;;  %v1637_v18 = vsel %vm425_vm4, %v1632_v47, %v1636_v4  ;;  %1861 = vrot.lane.b32.xlu0 %v1822_v2, %s3685_s11  ;;  %v1799_v30 = vrot.slane %v4402_v28, 1  ;;  %v1513_v16 = vsel %vm4219_vm13, %v1415_v38, 0 }
 0x217   : > { %v1409_v59 = vshll.u32 %v1322_v56, 16  ;;  %v1304_v44 = vmax.f32 %v1272_v26, 0.0  ;;  %v1432_v27 = vor.u32 %v1430_v42, %v1429_v60  ;;  %v1305_v55 = vmax.f32 %v1273_v7, 0.0  ;;  %1740 = vrot.lane.b32.xlu1 %v1637_v18, %s3681_s24 }
 0x218   : > { %v1800_v63 = vrot.slane %v1504_v54, 1  ;;  %v1665_v62 = vshll.u32 %v4406_v37, 16  ;;  %v1670_v41 = vshll.u32 %v1513_v16, 16  ;;  %v1557_v5 = vshll.u32 %v4402_v28, 16 }
 0x219   : > { %v1411_v43 = vor.u32 %v1409_v59, %v4397_v13  ;;  %v1443_v33 = vrot.slane %v1441_v32, 7  ;;  %v1663_v49 = vshrl.u32 %v4406_v37, 16  ;;  %v1555_v8 = vshrl.u32 %v4402_v28, 16  ;;  %v1196_v32 = vpop.f32.mrf.mxu1 }
 0x21a   : > { %v1801_v56 = vsel %vm678_vm2, %v1799_v30, %v1800_v63  ;;  %v1667_v38 = vrot.slane %v1665_v62, 1  ;;  %v1559_v31 = vrot.slane %v1557_v5, 1  ;;  %v1562_v11 = vshll.u32 %v1504_v54, 16 }
 0x21b   : > { %v4426_v12 = vsel %vm4219_vm13, 0, %v1432_v27  ;;  %v4428_v53 = vpack.c.bf16 %v1305_v55, %v1304_v44  ;;  %v1444_v57 = vshll.u32 %v1327_v36, 16  ;;  %1847 = vrot.lane.b32.xlu1 %v1801_v56, %s3685_s11  ;;  %v1672_v10 = vrot.slane %v1670_v41, 1 }
 0x21c   : > { %v1668_v23 = vor.u32 %v1667_v38, %v1663_v49  ;;  %v1560_v1 = vor.u32 %v1559_v31, %v1555_v8  ;;  %v1564_v24 = vrot.slane %v1562_v11, 1  ;;  %v4434_v6 = vsel %vm4219_vm13, 0, %v4359_v3 }
 0x21d   : > { %v4438_v25 = vsel %vm4219_vm13, 0, %v1411_v43  ;;  %v1446_v26 = vor.u32 %v1444_v57, %v1443_v33  ;;  %v1826_v61 = vrot.slane %v4406_v37, 1  ;;  %v1506_v0 = vsel %vm4219_vm13, %v4335_v48, 0 }
 0x21e   : > { %v1673_v39 = vsel %vm425_vm4, %v1668_v23, %v1672_v10  ;;  %v1565_v7 = vsel %vm425_vm4, %v1560_v1, %v1564_v24  ;;  %v1805_v36 = vrot.slane %v4434_v6, 1  ;;  %v1515_v3 = vsel %vm4219_vm13, %v1429_v60, 0 }
 0x21f   : > { %v1240_v9 = vmul.f32 %v4202_v46, %v4348_v34  ;;  %1746 = vrot.lane.b32.xlu0 %v1673_v39, %s3681_s24  ;;  %1728 = vrot.lane.b32.xlu1 %v1565_v7, %s3681_s24  ;;  %v1827_v47 = vrot.slane %v1513_v16, 1  ;;  %v1689_v4 = vshll.u32 %v4426_v12, 16  ;;  %v1694_v48 = vshll.u32 %v1515_v3, 16 }
 0x220   : > { %v1420_v42 = vshrl.u32 %v4428_v53, 16  ;;  %v1806_v2 = vrot.slane %v1506_v0, 1  ;;  %v1581_v18 = vshll.u32 %v4434_v6, 16  ;;  %v1586_v54 = vshll.u32 %v1506_v0, 16 }
 0x221   : > { %v4458_v60 = vsel %vm4219_vm13, 0, %v1446_v26  ;;  %v1828_v34 = vsel %vm678_vm2, %v1826_v61, %v1827_v47  ;;  %v1687_v30 = vshrl.u32 %v4426_v12, 16  ;;  %v1691_v59 = vrot.slane %v1689_v4, 1 }
 0x222   : > { %v1807_v16 = vsel %vm678_vm2, %v1805_v36, %v1806_v2  ;;  %v1579_v44 = vshrl.u32 %v4434_v6, 16  ;;  %v1583_v27 = vrot.slane %v1581_v18, 1  ;;  %v4467_v55 = vsel %vm4219_vm13, 0, %v4387_v19 }
 0x223   : > { %v1241_v63 = vmul.f32 %v4202_v46, %v1196_v32  ;;  %1865 = vrot.lane.b32.xlu0 %v1828_v34, %s3685_s11  ;;  %1851 = vrot.lane.b32.xlu1 %v1807_v16, %s3685_s11  ;;  %v1692_v62 = vor.u32 %v1691_v59, %v1687_v30  ;;  %v1696_v41 = vrot.slane %v1694_v48, 1  ;;  %v1517_v5 = vsel %vm4219_vm13, %v1443_v33, 0 }
 0x224   : > { %v1584_v43 = vor.u32 %v1583_v27, %v1579_v44  ;;  %v1588_v49 = vrot.slane %v1586_v54, 1  ;;  %v1832_v8 = vrot.slane %v4426_v12, 1  ;;  %v1713_v56 = vshll.u32 %v4458_v60, 16 }
 0x225   : > { %v1697_v19 = vsel %vm425_vm4, %v1692_v62, %v1696_v41  ;;  %v1508_v46 = vsel %vm4219_vm13, %v4361_v35, 0  ;;  %v1811_v38 = vrot.slane %v4467_v55, 1  ;;  %v1605_v31 = vshll.u32 %v4467_v55, 16 }
 0x226   : > { %v1589_v11 = vsel %vm425_vm4, %v1584_v43, %v1588_v49  ;;  %v1711_v33 = vshrl.u32 %v4458_v60, 16  ;;  %v1715_v57 = vrot.slane %v1713_v56, 1  ;;  %v1718_v10 = vshll.u32 %v1517_v5, 16 }
 0x227   : > { %v1422_v23 = vrot.slane %v1420_v42, 7  ;;  %v1277_v1 = vadd.f32 %v4206_v50, %v1241_v63  ;;  %1750 = vrot.lane.b32.xlu0 %v1697_v19, %s3681_s24  ;;  %1732 = vrot.lane.b32.xlu1 %v1589_v11, %s3681_s24  ;;  %v1833_v24 = vrot.slane %v1515_v3, 1  ;;  %v1607_v26 = vrot.slane %v1605_v31, 1 }
 0x228   : > { %v1812_v35 = vrot.slane %v1508_v46, 1  ;;  %v1716_v61 = vor.u32 %v1715_v57, %v1711_v33  ;;  %v1603_v0 = vshrl.u32 %v4467_v55, 16  ;;  %v1610_v39 = vshll.u32 %v1508_v46, 16 }
 0x229   : > { %v1423_v7 = vshll.u32 %v4428_v53, 16  ;;  %v1276_v36 = vadd.f32 %v4206_v50, %v1240_v9  ;;  %v1834_v47 = vsel %vm678_vm2, %v1832_v8, %v1833_v24  ;;  %v1720_v48 = vrot.slane %v1718_v10, 1 }
 0x22a   : > { %v1813_v4 = vsel %vm678_vm2, %v1811_v38, %v1812_v35  ;;  %v1608_v42 = vor.u32 %v1607_v26, %v1603_v0  ;;  %v1653_v32 = vshll.u32 %v4438_v25, 16  ;;  %v1309_v3 = vmax.f32 %v1277_v1, 0.0 }
 0x22b   : > { %v1425_v2 = vor.u32 %v1423_v7, %v1422_v23  ;;  %1869 = vrot.lane.b32.xlu0 %v1834_v47, %s3685_s11  ;;  %1855 = vrot.lane.b32.xlu1 %v1813_v4, %s3685_s11  ;;  %v1721_v18 = vsel %vm425_vm4, %v1716_v61, %v1720_v48  ;;  %v1612_v54 = vrot.slane %v1610_v39, 1  ;;  %v1308_v53 = vmax.f32 %v1276_v36, 0.0 }
 0x22c   : > { %v1512_v50 = vsel %vm4219_vm13, %v4397_v13, 0  ;;  %v1838_v34 = vrot.slane %v4458_v60, 1  ;;  %v1817_v30 = vrot.slane %v4367_v52, 1  ;;  %v1655_v59 = vrot.slane %v1653_v32, 1 }
 0x22d   : > { %v1613_v9 = vsel %vm425_vm4, %v1608_v42, %v1612_v54  ;;  %v4504_v16 = vsel %vm4219_vm13, 0, %v1425_v2  ;;  %v1326_v44 = vpack.c.bf16 %v1309_v3, %v1308_v53  ;;  %v1839_v27 = vrot.slane %v1517_v5, 1 }
 0x22e   : > { %v1818_v63 = vrot.slane %v4384_v17, 1  ;;  %v1651_v13 = vshrl.u32 %v4438_v25, 16  ;;  %v1658_v62 = vshll.u32 %v1512_v50, 16  ;;  %v1677_v8 = vshll.u32 %v4504_v16, 16 }
 0x22f   : > { %1754 = vrot.lane.b32.xlu0 %v1721_v18, %s3681_s24  ;;  %1736 = vrot.lane.b32.xlu1 %v1613_v9, %s3681_s24  ;;  %v1840_v41 = vsel %vm678_vm2, %v1838_v34, %v1839_v27  ;;  %v1434_v56 = vshrl.u32 %v1326_v44, 16  ;;  %v1514_v5 = vsel %vm4219_vm13, %v1422_v23, 0  ;;  %v3686_v17 = vmov 0  }
 0x230   : > { %v1819_v43 = vsel %vm678_vm2, %v1817_v30, %v1818_v63  ;;  %v1656_v49 = vor.u32 %v1655_v59, %v1651_v13  ;;  %v1660_v19 = vrot.slane %v1658_v62, 1  ;;  %v1331_v46 = vrot.slane %v3686_v17, 7 }
 0x231   : > { %v1823_v31 = vrot.slane %v4438_v25, 1  ;;  %v1679_v11 = vrot.slane %v1677_v8, 1  ;;  %v1436_v33 = vrot.slane %v1434_v56, 7  ;;  %v1824_v57 = vrot.slane %v1512_v50, 1 }
 0x232   : > { %v1661_v38 = vsel %vm425_vm4, %v1656_v49, %v1660_v19  ;;  %v1675_v10 = vshrl.u32 %v4504_v16, 16  ;;  %v1682_v1 = vshll.u32 %v1514_v5, 16  ;;  %v1437_v24 = vshll.u32 %v1326_v44, 16 }
 0x233   : > { %1873 = vrot.lane.b32.xlu0 %v1840_v41, %s3685_s11  ;;  %1859 = vrot.lane.b32.xlu1 %v1819_v43, %s3685_s11  ;;  %v4523_v26 = vsel %vm4219_vm13, 0, %v1331_v46  ;;  %v1825_v23 = vsel %vm678_vm2, %v1823_v31, %v1824_v57  ;;  %v1501_v7 = vsel %vm4219_vm13, %v1331_v46, 0  ;;  %v1829_v47 = vrot.slane %v4504_v16, 1  ;;  %v3622_v46 = vld [vmem:[%s5227_s2 + $0x20] ss:$0 sps:$4 sm:$0xff]  }
 0x234   : > { %v1680_v35 = vor.u32 %v1679_v11, %v1675_v10  ;;  %v1439_v61 = vor.u32 %v1437_v24, %v1436_v33  ;;  %v1684_v0 = vrot.slane %v1682_v1, 1  ;;  %v1521_v39 = vshll.u32 %v4523_v26, 16  ;;  %v3627_v11 = vld [vmem:[%s3732_s23 + $0xc] sm:$0xf]  ;;  %v3628_v10 = vld [vmem:[%s3732_s23 + $0x14] sm:$0x1]  ;;  %3565 = vmatprep.subr.msk.bf16.mxu1 %vm2159_vm15, %v3622_v46 }
 0x235   : > { %v1830_v48 = vrot.slane %v1514_v5, 1  ;;  %v1519_v42 = vshrl.u32 %v4523_v26, 16  ;;  %v1526_v2 = vshll.u32 %v1501_v7, 16  ;;  %v1516_v3 = vsel %vm4219_vm13, %v1436_v33, 0 }
 0x236   : > { %v1685_v36 = vsel %vm425_vm4, %v1680_v35, %v1684_v0  ;;  %v4535_v4 = vsel %vm4219_vm13, 0, %v1439_v61  ;;  %v1523_v32 = vrot.slane %v1521_v39, 1  ;;  %v1836_v50 = vrot.slane %v1516_v3, 1 }
 0x237   : > { %1744 = vrot.lane.b32.xlu1 %v1661_v38, %s3681_s24  ;;  %v1831_v18 = vsel %vm678_vm2, %v1829_v47, %v1830_v48  ;;  %v1835_v54 = vrot.slane %v4535_v4, 1  ;;  %v1701_v53 = vshll.u32 %v4535_v4, 16  ;;  %v1528_v34 = vrot.slane %v1526_v2, 1  ;;  %v2783_v38 = vld [vmem:[%s5229_s4] sm:$0x3] }
 0x238   : > { %v1524_v9 = vor.u32 %v1523_v32, %v1519_v42  ;;  %v1706_v44 = vshll.u32 %v1516_v3, 16  ;;  %v1699_v27 = vshrl.u32 %v4535_v4, 16  ;;  %v1790_v62 = vrot.slane %v4523_v26, 1  ;;  %3566 = vmatprep.subr.msk.bf16.mxu0 %vm1043_vm5, %v2783_v38 }
 0x239   : > { %v1837_v30 = vsel %vm678_vm2, %v1835_v54, %v1836_v50  ;;  %v1703_v59 = vrot.slane %v1701_v53, 1  ;;  %v1791_v41 = vrot.slane %v1501_v7, 1  ;;  %v2881_v31 = vsel %vm1043_vm5, %v2783_v38, 0  ;;  %v3624_v7 = vld [vmem:[%s5227_s2 + $0x10] sm:$0xff]   ;;  %v3625_v53 = vld [vmem:[%s5227_s2 + $0x8] sm:$0xff]  }
 0x23a   : > { %v1529_v20 = vsel %vm425_vm4, %v1524_v9, %v1528_v34  ;;  %v1708_v13 = vrot.slane %v1706_v44, 1  ;;  %v2400_v33 = vshrl.u32 %v3627_v11, 16  ;;  %v2403_v57 = vshll.u32 %v3627_v11, 16  ;;  %3524 = vmatpush3.bf16.msra.mxu0 %v2881_v31  ;;  %v3637_v11 = vld [vmem:[%s3732_s23 + $0x80] sm:$0x1] }
 0x23b   : > { %1863 = vrot.lane.b32.xlu1 %v1825_v23, %s3685_s11  ;;  %v1704_v63 = vor.u32 %v1703_v59, %v1699_v27  ;;  %v1792_v49 = vsel %vm678_vm2, %v1790_v62, %v1791_v41  ;;  %v2419_v1 = vshll.u32 %v3628_v10, 16  ;;  %v2161_v24 = vsel %vm2159_vm15, %v3622_v46, 0  ;;  %v3629_v23 = vld [vmem:[%s3732_s23 + $0x10] sm:$0xf]  ;;  %v3626_v59 = vld [vmem:[%s5227_s2] sm:$0xff]  }
 0x23c   : > { %v2409_v35 = vshll.u32 %v3629_v23, 16  ;;  %v2413_v61 = vshrl.u32 %v3629_v23, 16  ;;  %3482 = vmatpush3.bf16.msra.mxu1 %v2161_v24  ;;  %v2402_v0 = vrot.slane %v2400_v33, 4  ;;  %v2405_v39 = vrot.slane %v2403_v57, 5  ;;  %v3631_v41 = vld [vmem:[%s3732_s23 + $0x2c] sm:$0x1] }
 0x23d   : > { %v1709_v43 = vsel %vm425_vm4, %v1704_v63, %v1708_v13  ;;  %v2421_v32 = vrot.slane %v2419_v1, 5  ;;  %v3630_v13 = vld [vmem:[%s3732_s23 + $0x38] sm:$0x1]  ;;  %v3635_v46 = vld [vmem:[%s3732_s23 + $0x68] sm:$0x1]  ;;  %v2635_v33 = vshll.u32 %v3637_v11, 16 }
 0x23e   : > { %v2415_v47 = vrot.slane %v2413_v61, 4  ;;  %v2406_v42 = vor.u32 %v2405_v39, %v2402_v0  ;;  %v2491_v62 = vshll.u32 %v3630_v13, 16  ;;  %v2587_v38 = vshll.u32 %v3635_v46, 16  ;;  %v3638_v57 = vld [vmem:[%s3732_s23 + $0x8c] sm:$0x1] }
 0x23f   : > { %1748 = vrot.lane.b32.xlu1 %v1685_v36, %s3681_s24  ;;  %v2411_v36 = vrot.slane %v2409_v35, 5  ;;  %v2659_v10 = vshll.u32 %v3638_v57, 16  ;;  %v3639_v1 = vld [vmem:[%s3732_s23 + $0xa4] sm:$0x1] }
 0x240   : > { %v2407_v54 = vrot.slane %v2406_v42, 4  ;;  %v2707_v24 = vshll.u32 %v3639_v1, 16  ;;  %v4616_v23 = vrot.slane %v2491_v62, 5 }
 0x241   : > { %v2416_v3 = vor.u32 %v2415_v47, %v2411_v36  ;;  %v4632_v42 = vrot.slane %v2659_v10, 5 }
 0x243   : > { %1867 = vrot.lane.b32.xlu1 %v1831_v18, %s3685_s11  ;;  %v2417_v50 = vrot.slane %v2416_v3, 4 }
 0x245   : > { %v2422_v34 = vsel %vm3756_vm3, %v2417_v50, %v2421_v32  ;;  %v4634_v32 = vrot.slane %v2707_v24, 5 }
 0x247   : > { %1871 = vrot.lane.b32.xlu1 %v1837_v30, %s3685_s11 }
 0x24b   : > { %1722 = vrot.lane.b32.xlu1 %v1529_v20, %s3681_s24 }
 0x24f   : > { %1752 = vrot.lane.b32.xlu1 %v1709_v43, %s3681_s24  ;;  %v2467_v43 = vshll.u32 %v3631_v41, 16  ;;  %v3644_v41 = vld [vmem:[%s3732_s23 + $0x30] sm:$0xf] }
 0x251   : > { %v4618_v35 = vrot.slane %v2467_v43, 5  ;;  %v2472_v43 = vshrl.u32 %v3644_v41, 16 }
 0x253   : > { %1841 = vrot.lane.b32.xlu1 %v1792_v49, %s3685_s11  ;;  %v3632_v49 = vld [vmem:[%s3732_s23 + $0x44] sm:$0x1] }
 0x25a   : > { %v1846_v8 = vpop.permute.xlu0 %1845 }
 0x25e   : > { %v1727_v56 = vpop.permute.xlu1 %1726 }
 0x25f   : > { %v1880_v19 = vsel %vm806_vm7, %v4230_v21, %v1727_v56  ;;  %v1844_v17 = vpop.permute.xlu0 %1843  ;;  %v3623_v21 = vld [vmem:[%s5227_s2 + $0x18] sm:$0xff]  }
 0x260   : > { %v4557_v5 = vsel %vm1909_vm14, %v1880_v19, %v1846_v8  ;;  %3483 = vmatprep.subr.bf16.mxu1 %v3623_v21  ;;  %v2515_v8 = vshll.u32 %v3632_v49, 16  ;;  %v3634_v19 = vld [vmem:[%s3732_s23 + $0x5c] sm:$0x1]  ;;  %v2475_v49 = vshll.u32 %v3644_v41, 16 }
 0x261   : > { %1962 = vrot.lane.b32.xlu1 %v4557_v5, %s3684_s8  ;;  %3484 = vmatpush3.bf16.msra.mxu1 %v3623_v21  ;;  %v3636_v21 = vld [vmem:[%s3732_s23 + $0x74] sm:$0x1] }
 0x262   : > { %3485 = vmatprep.subr.bf16.mxu1 %v3624_v7  ;;  %v2611_v31 = vshll.u32 %v3636_v21, 16  ;;  %v4620_v61 = vrot.slane %v2515_v8, 5  ;;  %v3645_v8 = vld [vmem:[%s3732_s23 + $0x34] sm:$0xf]  ;;  %v2477_v57 = vrot.slane %v2475_v49, 5 }
 0x263   : > { %v3647_v49 = vld [vmem:[%s3732_s23 + $0x3c] sm:$0xf] }
 0x264   : > { %v4628_v47 = vrot.slane %v2611_v31, 5 }
 0x265   : > { %3486 = vmatpush3.bf16.msra.mxu1 %v3624_v7 }
 0x266   : > { %v1725_v48 = vpop.permute.xlu0 %1724  ;;  %3487 = vmatprep.subr.bf16.mxu1 %v3625_v53 }
 0x267   : > { %v1878_v2 = vsel %vm806_vm7, %v4244_v58, %v1725_v48  ;;  %v2412_v58 = vsel %vm3756_vm3, %v2407_v54, %v2411_v36  ;;  %v4626_v36 = vrot.slane %v2587_v38, 5  ;;  %v4630_v48 = vrot.slane %v2635_v33, 5  ;;  %v3641_v54 = vld [vmem:[%s3732_s23 + $0x24] sm:$0xf] }
 0x268   : > { %v4581_v18 = vsel %vm1909_vm14, %v1878_v2, %v1844_v17  ;;  %v3351_v30 = vcombine.low %v2412_v58, %v2422_v34  ;;  %v2563_v17 = vshll.u32 %v3634_v19, 16  ;;  %v3640_v2 = vld [vmem:[%s3732_s23 + $0x98] sm:$0x1]  ;;  %v2451_v50 = vshll.u32 %v3641_v54, 16  ;;  %v3642_v58 = vld [vmem:[%s3732_s23 + $0x28] sm:$0xf] }
 0x269   : > { %1960 = vrot.lane.b32.xlu0 %v4581_v18, %s3684_s8  ;;  %3488 = vmatpush3.bf16.msra.mxu1 %v3625_v53  ;;  %v2683_v3 = vshll.u32 %v3640_v2, 16  ;;  %v2448_v53 = vshrl.u32 %v3641_v54, 16  ;;  %v2457_v34 = vshll.u32 %v3642_v58, 16  ;;  %v2474_v33 = vrot.slane %v2472_v43, 4 }
 0x26a   : > { %v4588_v9 = vpop.permute.xlu0 %1849  ;;  %3525 = vmatprep.mubr.msk.bf16.mxu0 %vm769_vm6, %v3351_v30  ;;  %3489 = vmatprep.subr.bf16.mxu1 %v3626_v59  ;;  %v4624_v7 = vrot.slane %v2563_v17, 5  ;;  %v2461_v30 = vshrl.u32 %v3642_v58, 16  ;;  %v2453_v46 = vrot.slane %v2451_v50, 5  ;;  %v2485_v2 = vshrl.u32 %v3645_v8, 16 }
 0x26b   : > { %3526 = vmatmul.mubr.msk.bf16.vlgmr.msra.gmra.mxu0 %vm769_vm6, %v3784_v51  ;;  %v3633_v51 = vld [vmem:[%s3732_s23 + $0x50] sm:$0x1]  ;;  %v2450_v17 = vrot.slane %v2448_v53, 4  ;;  %v2459_v38 = vrot.slane %v2457_v34, 5  ;;  %v4649_v54 = vrot.slane %v2683_v3, 5  ;;  %v2478_v34 = vor.u32 %v2477_v57, %v2474_v33 }
 0x26c   : > { %v2539_v56 = vshll.u32 %v3633_v51, 16  ;;  %v2481_v51 = vshll.u32 %v3645_v8, 16  ;;  %v2463_v11 = vrot.slane %v2461_v30, 4  ;;  %v2487_v30 = vrot.slane %v2485_v2, 4 }
 0x26d   : > { %1993 = vrot.lane.b32.xlu0 %v4557_v5, %s3687_s25  ;;  %3490 = vmatpush3.bf16.msra.mxu1 %v3626_v59  ;;  %v3643_v59 = vld [vmem:[%s3732_s23 + $0xbc] sm:$0x1]  ;;  %v2454_v1 = vor.u32 %v2453_v46, %v2450_v17  ;;  %v2496_v8 = vshrl.u32 %v3647_v49, 16 }
 0x26e   : > { %v1731_v44 = vpop.permute.xlu0 %1730  ;;  %v4622_v39 = vrot.slane %v2539_v56, 5  ;;  %v2755_v13 = vshll.u32 %v3643_v59, 16  ;;  %v3646_v56 = vld [vmem:[%s3732_s23 + $0xb0] sm:$0x1]  ;;  %v2483_v24 = vrot.slane %v2481_v51, 5  ;;  %v2464_v50 = vor.u32 %v2463_v11, %v2459_v38 }
 0x26f   : > { %v2731_v19 = vshll.u32 %v3646_v56, 16  ;;  %v1884_v21 = vsel %vm806_vm7, %v4274_v40, %v1731_v44  ;;  %v2455_v44 = vrot.slane %v2454_v1, 4  ;;  %v2498_v33 = vrot.slane %v2496_v8, 4  ;;  %v3649_v1 = vld [vmem:[%s3732_s23 + $0x48] sm:$0xf] }
 0x270   : > { %v4651_v58 = vrot.slane %v2755_v13, 5  ;;  %v2465_v3 = vrot.slane %v2464_v50, 4  ;;  %v2479_v13 = vrot.slane %v2478_v34, 4  ;;  %v2488_v43 = vor.u32 %v2487_v30, %v2483_v24 }
 0x271   : > { %v4653_v59 = vrot.slane %v2731_v19, 5  ;;  %v2460_v41 = vsel %vm3756_vm3, %v2455_v44, %v2459_v38  ;;  %v2523_v2 = vshll.u32 %v3649_v1, 16 }
 0x272   : > { %v4602_v20 = vpop.permute.xlu0 %1853  ;;  %v2489_v11 = vrot.slane %v2488_v43, 4 }
 0x273   : > { %v2525_v43 = vrot.slane %v2523_v2, 5 }
 0x277   : > { %v1735_v27 = vpop.permute.xlu0 %1734 }
 0x278   : > { %v1888_v10 = vsel %vm806_vm7, %v4299_v15, %v1735_v27  ;;  %v4659_v15 = vsel %vm1909_vm14, %v1884_v21, %v4588_v9  ;;  %v2470_v9 = vsel %vm3756_vm3, %v2465_v3, %v4618_v35  ;;  %v2484_v21 = vsel %vm3756_vm3, %v2479_v13, %v2483_v24 }
 0x279   : > { %v4663_v27 = vsel %vm1909_vm14, %v1888_v10, %v4602_v20  ;;  %v3648_v20 = vld [vmem:[%s3732_s23 + $0x40] sm:$0xf]  ;;  %v3353_v38 = vcombine.low %v2460_v41, %v2470_v9  ;;  %v2520_v24 = vshrl.u32 %v3649_v1, 16  ;;  %v3651_v9 = vld [vmem:[%s3732_s23 + $0x54] sm:$0xf] }
 0x27a   : > { %v2505_v19 = vshll.u32 %v3648_v20, 16  ;;  %v2509_v17 = vshrl.u32 %v3648_v20, 16  ;;  %v2544_v20 = vshrl.u32 %v3651_v9, 16 }
 0x27b   : > { %v4604_v63 = vpop.permute.xlu0 %1857  ;;  %3529 = vmatprep.mubr.msk.bf16.mxu0 %vm769_vm6, %v3353_v38  ;;  %v2522_v41 = vrot.slane %v2520_v24, 4  ;;  %v3652_v38 = vld [vmem:[%s3732_s23 + $0x58] sm:$0xf] }
 0x27c   : > { %v2507_v10 = vrot.slane %v2505_v19, 5  ;;  %v2511_v35 = vrot.slane %v2509_v17, 4  ;;  %v2547_v19 = vshll.u32 %v3651_v9, 16  ;;  %v2546_v2 = vrot.slane %v2544_v20, 4 }
 0x27e   : > { %v2512_v13 = vor.u32 %v2511_v35, %v2507_v10 }
 0x27f   : > { %v1739_v0 = vpop.permute.xlu0 %1738 }
 0x280   : > { %v1892_v40 = vsel %vm806_vm7, %v4332_v14, %v1739_v0  ;;  %v2499_v14 = vshll.u32 %v3647_v49, 16 }
 0x281   : > { %v4670_v56 = vsel %vm1909_vm14, %v1892_v40, %v4604_v63  ;;  %v3650_v40 = vld [vmem:[%s3732_s23 + $0x4c] sm:$0xf] }
 0x282   : > { %v2501_v57 = vrot.slane %v2499_v14, 5  ;;  %v2529_v44 = vshll.u32 %v3650_v40, 16  ;;  %v2533_v30 = vshrl.u32 %v3650_v40, 16  ;;  %v3653_v40 = vld [vmem:[%s3732_s23 + $0x60] sm:$0xf] }
 0x284   : > { %v1743_v31 = vpop.permute.xlu0 %1742  ;;  %v2502_v34 = vor.u32 %v2501_v57, %v2498_v33  ;;  %v2531_v14 = vrot.slane %v2529_v44, 5  ;;  %v2568_v44 = vshrl.u32 %v3653_v40, 16 }
 0x285   : > { %v1896_v3 = vsel %vm806_vm7, %v4352_v22, %v1743_v31  ;;  %v2513_v22 = vrot.slane %v2512_v13, 4  ;;  %v2526_v31 = vor.u32 %v2525_v43, %v2522_v41 }
 0x286   : > { %v2503_v8 = vrot.slane %v2502_v34, 4 }
 0x287   : > { %v2527_v35 = vrot.slane %v2526_v31, 4 }
 0x288   : > { %v1862_v0 = vpop.permute.xlu0 %1861  ;;  %v2508_v17 = vsel %vm3756_vm3, %v2503_v8, %v2507_v10 }
 0x289   : > { %v4640_v62 = vpop.permute.xlu1 %1740 }
 0x28a   : > { %v4710_v33 = vsel %vm806_vm7, %v4367_v52, %v4640_v62  ;;  %v2532_v52 = vsel %vm3756_vm3, %v2527_v35, %v2531_v14 }
 0x28d   : > { %v1848_v53 = vpop.permute.xlu1 %1847 }
 0x291   : > { %v1729_v51 = vpop.permute.xlu1 %1728  ;;  %v1747_v49 = vpop.permute.xlu0 %1746 }
 0x292   : > { %v1882_v46 = vsel %vm806_vm7, %v4402_v28, %v1729_v51  ;;  %v2494_v28 = vsel %vm3756_vm3, %v2489_v11, %v4616_v23  ;;  %v4696_v23 = vsel %vm1909_vm14, %v1896_v3, %v1862_v0  ;;  %v2535_v51 = vrot.slane %v2533_v30, 4  ;;  %v3654_v3 = vld [vmem:[%s3732_s23 + $0x64] sm:$0xf] }
 0x293   : > { %v4681_v63 = vsel %vm1909_vm14, %v1882_v46, %v1848_v53  ;;  %v3354_v53 = vcombine.low %v2484_v21, %v2494_v28  ;;  %v2553_v21 = vshll.u32 %v3652_v38, 16  ;;  %v2557_v11 = vshrl.u32 %v3652_v38, 16  ;;  %v3656_v38 = vld [vmem:[%s3732_s23 + $0x70] sm:$0xf] }
 0x294   : > { %1964 = vrot.lane.b32.xlu0 %v4681_v63, %s3684_s8  ;;  %1995 = vrot.lane.b32.xlu1 %v4681_v63, %s3687_s25  ;;  %v2536_v46 = vor.u32 %v2535_v51, %v2531_v14  ;;  %v2518_v28 = vsel %vm3756_vm3, %v2513_v22, %v4620_v61  ;;  %v2571_v30 = vshll.u32 %v3653_v40, 16  ;;  %v2577_v13 = vshll.u32 %v3654_v3, 16 }
 0x295   : > { %v1852_v50 = vpop.permute.xlu1 %1851  ;;  %3530 = vmatmul.mubr.msk.bf16.gmra.mxu0 %vm769_vm6, %v3354_v53  ;;  %v3355_v1 = vcombine.low %v2508_v17, %v2518_v28  ;;  %v2555_v61 = vrot.slane %v2553_v21, 5  ;;  %v2559_v62 = vrot.slane %v2557_v11, 4  ;;  %v1866_v53 = vpop.permute.xlu0 %1865  ;;  %v1900_v41 = vsel %vm806_vm7, %v4406_v37, %v1747_v49 }
 0x296   : > { %v2537_v24 = vrot.slane %v2536_v46, 4  ;;  %v2570_v51 = vrot.slane %v2568_v44, 4  ;;  %v2573_v22 = vrot.slane %v2571_v30, 5  ;;  %v2579_v31 = vrot.slane %v2577_v13, 5  ;;  %v3657_v44 = vld [vmem:[%s3732_s23 + $0x78] sm:$0xf] }
 0x297   : > { %3533 = vmatprep.mubr.msk.bf16.mxu0 %vm769_vm6, %v3355_v1  ;;  %v2560_v14 = vor.u32 %v2559_v62, %v2555_v61  ;;  %v2581_v9 = vshrl.u32 %v3654_v3, 16  ;;  %v2601_v21 = vshll.u32 %v3656_v38, 16  ;;  %v2605_v11 = vshrl.u32 %v3656_v38, 16 }
 0x298   : > { %1997 = vrot.lane.b32.xlu0 %v4659_v15, %s3687_s25  ;;  %1966 = vrot.lane.b32.xlu1 %v4659_v15, %s3684_s8  ;;  %v2574_v49 = vor.u32 %v2573_v22, %v2570_v51  ;;  %v2616_v30 = vshrl.u32 %v3657_v44, 16  ;;  %v2619_v3 = vshll.u32 %v3657_v44, 16 }
 0x299   : > { %v1733_v0 = vpop.permute.xlu1 %1732  ;;  %v2561_v20 = vrot.slane %v2560_v14, 4  ;;  %v2583_v46 = vrot.slane %v2581_v9, 4 }
 0x29a   : > { %v1886_v57 = vsel %vm806_vm7, %v4434_v6, %v1733_v0  ;;  %v2549_v6 = vrot.slane %v2547_v19, 5  ;;  %v3655_v19 = vld [vmem:[%s3732_s23 + $0x6c] sm:$0xf]  ;;  %v2618_v51 = vrot.slane %v2616_v30, 4  ;;  %v2621_v22 = vrot.slane %v2619_v3, 5 }
 0x29b   : > { %v4718_v10 = vsel %vm1909_vm14, %v1886_v57, %v1852_v50  ;;  %v2542_v50 = vsel %vm3756_vm3, %v2537_v24, %v4622_v39  ;;  %v2592_v0 = vshrl.u32 %v3655_v19, 16  ;;  %v2595_v17 = vshll.u32 %v3655_v19, 16  ;;  %v1751_v24 = vpop.permute.xlu0 %1750 }
 0x29c   : > { %1968 = vrot.lane.b32.xlu0 %v4718_v10, %s3684_s8  ;;  %1999 = vrot.lane.b32.xlu1 %v4718_v10, %s3687_s25  ;;  %v3356_v43 = vcombine.low %v2532_v52, %v2542_v50  ;;  %v2550_v8 = vor.u32 %v2549_v6, %v2546_v2  ;;  %v4742_v57 = vsel %vm1909_vm14, %v1900_v41, %v1866_v53  ;;  %v2575_v6 = vrot.slane %v2574_v49, 4 }
 0x29d   : > { %v1856_v34 = vpop.permute.xlu1 %1855  ;;  %v2566_v1 = vsel %vm3756_vm3, %v2561_v20, %v4624_v7  ;;  %v2584_v62 = vor.u32 %v2583_v46, %v2579_v31  ;;  %v2603_v53 = vrot.slane %v2601_v21, 5  ;;  %v2607_v50 = vrot.slane %v2605_v11, 4 }
 0x29e   : > { %v2551_v39 = vrot.slane %v2550_v8, 4  ;;  %3534 = vmatmul.mubr.msk.bf16.gmra.mxu0 %vm769_vm6, %v3356_v43  ;;  %v4764_v13 = vsel %vm806_vm7, %v4426_v12, %v1751_v24 }
 0x29f   : > { %v2585_v40 = vrot.slane %v2584_v62, 4  ;;  %v2608_v8 = vor.u32 %v2607_v50, %v2603_v53 }
 0x2a0   : > { %2001 = vrot.lane.b32.xlu0 %v4663_v27, %s3687_s25  ;;  %1970 = vrot.lane.b32.xlu1 %v4663_v27, %s3684_s8  ;;  %v2556_v35 = vsel %vm3756_vm3, %v2551_v39, %v2555_v61  ;;  %v2597_v61 = vrot.slane %v2595_v17, 5 }
 0x2a1   : > { %v1737_v37 = vpop.permute.xlu1 %1736  ;;  %v3357_v52 = vcombine.low %v2556_v35, %v2566_v1  ;;  %v2590_v14 = vsel %vm3756_vm3, %v2585_v40, %v4626_v36  ;;  %v2609_v39 = vrot.slane %v2608_v8, 4 }
 0x2a2   : > { %v1890_v28 = vsel %vm806_vm7, %v4467_v55, %v1737_v37  ;;  %v2594_v55 = vrot.slane %v2592_v0, 4  ;;  %v2622_v0 = vor.u32 %v2621_v22, %v2618_v51  ;;  %v3659_v37 = vld [vmem:[%s3732_s23 + $0x84] sm:$0xf] }
 0x2a3   : > { %v4752_v2 = vsel %vm1909_vm14, %v1890_v28, %v1856_v34  ;;  %3537 = vmatprep.mubr.msk.bf16.mxu0 %vm769_vm6, %v3357_v52  ;;  %v2580_v34 = vsel %vm3756_vm3, %v2575_v6, %v2579_v31  ;;  %v3658_v31 = vld [vmem:[%s3732_s23 + $0x7c] sm:$0xf]  ;;  %v2640_v36 = vshrl.u32 %v3659_v37, 16  ;;  %v2643_v49 = vshll.u32 %v3659_v37, 16  ;;  %v3660_v52 = vld [vmem:[%s3732_s23 + $0x88] sm:$0xf] }
 0x2a4   : > { %1972 = vrot.lane.b32.xlu0 %v4752_v2, %s3684_s8  ;;  %2003 = vrot.lane.b32.xlu1 %v4752_v2, %s3687_s25  ;;  %v2598_v43 = vor.u32 %v2597_v61, %v2594_v55  ;;  %v2625_v9 = vshll.u32 %v3658_v31, 16  ;;  %v3358_v12 = vcombine.low %v2580_v34, %v2590_v14  ;;  %v2629_v20 = vshrl.u32 %v3658_v31, 16  ;;  %v3661_v55 = vld [vmem:[%s3732_s23 + $0x90] sm:$0xf]  ;;  %v3662_v34 = vld [vmem:[%s3732_s23 + $0x94] sm:$0xf] }
 0x2a5   : > { %v1860_v7 = vpop.permute.xlu1 %1859  ;;  %v2614_v21 = vsel %vm3756_vm3, %v2609_v39, %v4628_v47  ;;  %v2623_v35 = vrot.slane %v2622_v0, 4  ;;  %v2642_v1 = vrot.slane %v2640_v36, 4  ;;  %v2645_v24 = vrot.slane %v2643_v49, 5 }
 0x2a6   : > { %v4768_v41 = vsel %vm1909_vm14, %v4710_v33, %v1860_v7  ;;  %v2599_v33 = vrot.slane %v2598_v43, 4  ;;  %v2627_v17 = vrot.slane %v2625_v9, 5  ;;  %3538 = vmatmul.mubr.msk.bf16.gmra.mxu0 %vm769_vm6, %v3358_v12  ;;  %v2631_v11 = vrot.slane %v2629_v20, 4 }
 0x2a7   : > { %v2649_v6 = vshll.u32 %v3660_v52, 16  ;;  %v2653_v62 = vshrl.u32 %v3660_v52, 16  ;;  %v2664_v61 = vshrl.u32 %v3661_v55, 16  ;;  %v2646_v50 = vor.u32 %v2645_v24, %v2642_v1  ;;  %v3665_v24 = vld [vmem:[%s3732_s23 + $0xa8] sm:$0xf] }
 0x2a8   : > { %2005 = vrot.lane.b32.xlu0 %v4670_v56, %s3687_s25  ;;  %1974 = vrot.lane.b32.xlu1 %v4670_v56, %s3684_s8  ;;  %v2604_v38 = vsel %vm3756_vm3, %v2599_v33, %v2603_v53  ;;  %v2628_v47 = vsel %vm3756_vm3, %v2623_v35, %v2627_v17  ;;  %v2667_v7 = vshll.u32 %v3661_v55, 16  ;;  %v2673_v40 = vshll.u32 %v3662_v34, 16  ;;  %v3663_v33 = vld [vmem:[%s3732_s23 + $0x9c] sm:$0xf] }
 0x2a9   : > { %v1745_v19 = vpop.permute.xlu1 %1744  ;;  %v3359_v28 = vcombine.low %v2604_v38, %v2614_v21  ;;  %v2651_v3 = vrot.slane %v2649_v6, 5  ;;  %v2655_v43 = vrot.slane %v2653_v62, 4  ;;  %v2647_v8 = vrot.slane %v2646_v50, 4 }
 0x2aa   : > { %v1898_v46 = vsel %vm806_vm7, %v4438_v25, %v1745_v19  ;;  %v2632_v25 = vor.u32 %v2631_v11, %v2627_v17  ;;  %v2666_v14 = vrot.slane %v2664_v61, 4  ;;  %v2669_v51 = vrot.slane %v2667_v7, 5  ;;  %v3664_v11 = vld [vmem:[%s3732_s23 + $0xa0] sm:$0xf] }
 0x2ab   : > { %3541 = vmatprep.mubr.msk.bf16.mxu0 %vm769_vm6, %v3359_v28  ;;  %v2675_v22 = vrot.slane %v2673_v40, 5  ;;  %v2656_v9 = vor.u32 %v2655_v43, %v2651_v3  ;;  %v2677_v12 = vshrl.u32 %v3662_v34, 16  ;;  %v2688_v39 = vshrl.u32 %v3663_v33, 16 }
 0x2ac   : > { %1976 = vrot.lane.b32.xlu0 %v4768_v41, %s3684_s8  ;;  %2007 = vrot.lane.b32.xlu1 %v4768_v41, %s3687_s25  ;;  %v2633_v30 = vrot.slane %v2632_v25, 4  ;;  %v2652_v0 = vsel %vm3756_vm3, %v2647_v8, %v2651_v3  ;;  %v2670_v17 = vor.u32 %v2669_v51, %v2666_v14  ;;  %v2691_v37 = vshll.u32 %v3663_v33, 16  ;;  %v1870_v8 = vpop.permute.xlu0 %1869 }
 0x2ad   : > { %v1864_v53 = vpop.permute.xlu1 %1863  ;;  %v2657_v49 = vrot.slane %v2656_v9, 4  ;;  %v2690_v38 = vrot.slane %v2688_v39, 4  ;;  %v2697_v28 = vshll.u32 %v3664_v11, 16  ;;  %v2701_v35 = vshrl.u32 %v3664_v11, 16 }
 0x2ae   : > { %v4798_v44 = vsel %vm1909_vm14, %v1898_v46, %v1864_v53  ;;  %v2638_v31 = vsel %vm3756_vm3, %v2633_v30, %v4630_v48  ;;  %v2679_v46 = vrot.slane %v2677_v12, 4  ;;  %v2671_v48 = vrot.slane %v2670_v17, 4  ;;  %v3666_v30 = vld [vmem:[%s3732_s23 + $0xac] sm:$0xf] }
 0x2af   : > { %v3360_v19 = vcombine.low %v2628_v47, %v2638_v31  ;;  %v2693_v21 = vrot.slane %v2691_v37, 5  ;;  %v2712_v25 = vshrl.u32 %v3665_v24, 16  ;;  %v2715_v52 = vshll.u32 %v3665_v24, 16 }
 0x2b0   : > { %2009 = vrot.lane.b32.xlu0 %v4696_v23, %s3687_s25  ;;  %1978 = vrot.lane.b32.xlu1 %v4696_v23, %s3684_s8  ;;  %v2680_v1 = vor.u32 %v2679_v46, %v2675_v22  ;;  %v2676_v55 = vsel %vm3756_vm3, %v2671_v48, %v2675_v22  ;;  %v2699_v53 = vrot.slane %v2697_v28, 5  ;;  %v2703_v7 = vrot.slane %v2701_v35, 4  ;;  %v3667_v22 = vld [vmem:[%s3732_s23 + $0xb4] sm:$0xf]  ;;  %v3669_v48 = vld [vmem:[%s3732_s23 + $0xc0] sm:$0xf] }
 0x2b1   : > { %v1749_v20 = vpop.permute.xlu1 %1748  ;;  %3542 = vmatmul.mubr.msk.bf16.gmra.mxu0 %vm769_vm6, %v3360_v19  ;;  %v2694_v61 = vor.u32 %v2693_v21, %v2690_v38  ;;  %v2714_v34 = vrot.slane %v2712_v25, 4  ;;  %v2717_v40 = vrot.slane %v2715_v52, 5  ;;  %v2721_v3 = vshll.u32 %v3666_v30, 16 }
 0x2b2   : > { %v1902_v36 = vsel %vm806_vm7, %v4504_v16, %v1749_v20  ;;  %v2662_v16 = vsel %vm3756_vm3, %v2657_v49, %v4632_v42  ;;  %v2681_v50 = vrot.slane %v2680_v1, 4  ;;  %v2725_v43 = vshrl.u32 %v3666_v30, 16  ;;  %v3668_v49 = vld [vmem:[%s3732_s23 + $0xb8] sm:$0xf] }
 0x2b3   : > { %v3361_v62 = vcombine.low %v2652_v0, %v2662_v16  ;;  %v2695_v42 = vrot.slane %v2694_v61, 4  ;;  %v2704_v51 = vor.u32 %v2703_v7, %v2699_v53  ;;  %v2736_v31 = vshrl.u32 %v3667_v22, 16 }
 0x2b4   : > { %1980 = vrot.lane.b32.xlu0 %v4798_v44, %s3684_s8  ;;  %2011 = vrot.lane.b32.xlu1 %v4798_v44, %s3687_s25  ;;  %v2686_v14 = vsel %vm3756_vm3, %v2681_v50, %v4649_v54  ;;  %v2739_v9 = vshll.u32 %v3667_v22, 16  ;;  %v2718_v20 = vor.u32 %v2717_v40, %v2714_v34  ;;  %v2723_v19 = vrot.slane %v2721_v3, 5  ;;  %v3670_v34 = vld [vmem:[%s3732_s23 + $0xc4] sm:$0xf]  ;;  %v3671_v40 = vld [vmem:[%s3732_s23 + $0xc8] sm:$0x1] }
 0x2b5   : > { %v1868_v6 = vpop.permute.xlu1 %1867  ;;  %3545 = vmatprep.mubr.msk.bf16.mxu0 %vm769_vm6, %v3361_v62  ;;  %v3362_v33 = vcombine.low %v2676_v55, %v2686_v14  ;;  %v2700_v39 = vsel %vm3756_vm3, %v2695_v42, %v2699_v53  ;;  %v2705_v0 = vrot.slane %v2704_v51, 4  ;;  %v2727_v17 = vrot.slane %v2725_v43, 4  ;;  %v1755_v62 = vpop.permute.xlu0 %1754 }
 0x2b6   : > { %v4825_v47 = vsel %vm1909_vm14, %v1902_v36, %v1868_v6  ;;  %v2738_v37 = vrot.slane %v2736_v31, 4  ;;  %v2741_v36 = vrot.slane %v2739_v9, 5  ;;  %v2719_v54 = vrot.slane %v2718_v20, 4 }
 0x2b7   : > { %v2745_v46 = vshll.u32 %v3668_v49, 16  ;;  %v2749_v38 = vshrl.u32 %v3668_v49, 16  ;;  %v2760_v21 = vshrl.u32 %v3669_v48, 16  ;;  %v2710_v11 = vsel %vm3756_vm3, %v2705_v0, %v4634_v32 }
 0x2b8   : > { %2013 = vrot.lane.b32.xlu0 %v4742_v57, %s3687_s25  ;;  %1982 = vrot.lane.b32.xlu1 %v4742_v57, %s3684_s8  ;;  %v2728_v28 = vor.u32 %v2727_v17, %v2723_v19  ;;  %v2742_v35 = vor.u32 %v2741_v36, %v2738_v37  ;;  %v2763_v16 = vshll.u32 %v3669_v48, 16  ;;  %v4851_v1 = vsel %vm1909_vm14, %v4764_v13, %v1870_v8 }
 0x2b9   : > { %v1872_v12 = vpop.permute.xlu1 %1871  ;;  %3546 = vmatmul.mubr.msk.bf16.gmra.mxu0 %vm769_vm6, %v3362_v33  ;;  %v3363_v25 = vcombine.low %v2700_v39, %v2710_v11  ;;  %v2747_v52 = vrot.slane %v2745_v46, 5  ;;  %v2751_v6 = vrot.slane %v2749_v38, 4  ;;  %v2724_v55 = vsel %vm3756_vm3, %v2719_v54, %v2723_v19  ;;  %v1874_v0 = vpop.permute.xlu0 %1873 }
 0x2ba   : > { %v2729_v61 = vrot.slane %v2728_v28, 4  ;;  %v2743_v53 = vrot.slane %v2742_v35, 4  ;;  %v2762_v32 = vrot.slane %v2760_v21, 4  ;;  %v2765_v7 = vrot.slane %v2763_v16, 5 }
 0x2bb   : > { %3549 = vmatprep.mubr.msk.bf16.mxu0 %vm769_vm6, %v3363_v25  ;;  %v2752_v50 = vor.u32 %v2751_v6, %v2747_v52  ;;  %v2769_v42 = vshll.u32 %v3670_v34, 16  ;;  %v2773_v13 = vshrl.u32 %v3670_v34, 16  ;;  %v2779_v30 = vshll.u32 %v3671_v40, 16 }
 0x2bc   : > { %1984 = vrot.lane.b32.xlu0 %v4825_v47, %s3684_s8  ;;  %2015 = vrot.lane.b32.xlu1 %v4825_v47, %s3687_s25  ;;  %v2734_v3 = vsel %vm3756_vm3, %v2729_v61, %v4653_v59  ;;  %v2748_v43 = vsel %vm3756_vm3, %v2743_v53, %v2747_v52  ;;  %v2766_v22 = vor.u32 %v2765_v7, %v2762_v32 }
 0x2bd   : > { %v1723_v24 = vpop.permute.xlu1 %1722  ;;  %v3364_v14 = vcombine.low %v2724_v55, %v2734_v3  ;;  %v2753_v51 = vrot.slane %v2752_v50, 4  ;;  %v2771_v31 = vrot.slane %v2769_v42, 5  ;;  %v2775_v33 = vrot.slane %v2773_v13, 4 }
 0x2be   : > { %v2767_v20 = vrot.slane %v2766_v22, 4  ;;  %v2781_v19 = vrot.slane %v2779_v30, 5 }
 0x2bf   : > { %v2758_v59 = vsel %vm3756_vm3, %v2753_v51, %v4651_v58  ;;  %v2776_v17 = vor.u32 %v2775_v33, %v2771_v31 }
 0x2c0   : > { %2017 = vrot.lane.b32.xlu0 %v4851_v1, %s3687_s25  ;;  %1986 = vrot.lane.b32.xlu1 %v4851_v1, %s3684_s8  ;;  %v2772_v37 = vsel %vm3756_vm3, %v2767_v20, %v2771_v31 }
 0x2c1   : > { %v1753_v8 = vpop.permute.xlu1 %1752  ;;  %3550 = vmatmul.mubr.msk.bf16.gmra.mxu0 %vm769_vm6, %v3364_v14  ;;  %v2777_v58 = vrot.slane %v2776_v17, 4 }
 0x2c2   : > { %v1906_v9 = vsel %vm806_vm7, %v4535_v4, %v1753_v8  ;;  %v3365_v4 = vcombine.low %v2748_v43, %v2758_v59 }
 0x2c3   : > { %v4870_v39 = vsel %vm1909_vm14, %v1906_v9, %v1872_v12  ;;  %v1908_v12 = vsel %vm806_vm7, %v4458_v60, %v1755_v62  ;;  %v2782_v49 = vsel %vm3756_vm3, %v2777_v58, %v2781_v19  ;;  %v1876_v60 = vsel %vm806_vm7, %v4523_v26, %v1723_v24 }
 0x2c4   : > { %1988 = vrot.lane.b32.xlu0 %v4870_v39, %s3684_s8  ;;  %2019 = vrot.lane.b32.xlu1 %v4870_v39, %s3687_s25  ;;  %v1943_v36 = vsel %vm1909_vm14, %v1908_v12, %v1874_v0  ;;  %v3366_v46 = vcombine.low %v2772_v37, %v2782_v49 }
 0x2c5   : > { %3553 = vmatprep.mubr.msk.bf16.mxu0 %vm769_vm6, %v3365_v4  ;;  %v1842_v54 = vpop.permute.xlu1 %1841 }
 0x2c6   : > { %v1911_v38 = vsel %vm1909_vm14, %v1876_v60, %v1842_v54 }
 0x2c8   : > { %2021 = vrot.lane.b32.xlu0 %v1943_v36, %s3687_s25  ;;  %1990 = vrot.lane.b32.xlu1 %v1943_v36, %s3684_s8 }
 0x2c9   : > { %3554 = vmatmul.mubr.msk.bf16.gmra.mxu0 %vm769_vm6, %v3366_v46 }
 0x2cc   : > { %2023 = vrot.lane.b32.xlu1 %v1911_v38, %s3687_s25 }
 0x2d3   : > { %v1963_v29 = vpop.permute.xlu1 %1962 }
 0x2d4   : > { %v2028_v26 = vsel %vm957_vm9, %v4581_v18, %v1963_v29 }
 0x2db   : > { %v1961_v48 = vpop.permute.xlu0 %1960 }
 0x2dc   : > { %v2026_v21 = vsel %vm957_vm9, %v1911_v38, %v1961_v48 }
 0x2df   : > { %v1994_v11 = vpop.permute.xlu0 %1993 }
 0x2e0   : > { %v2059_v28 = vsel %vm2057_vm0, %v2026_v21, %v1994_v11 }
 0x2e1   : > { %3491 = vmatprep.mubr.msk.bf16.mxu1 %vm2126_vm1, %v2059_v28 }
 0x306   : > { %v1965_v35 = vpop.permute.xlu0 %1964  ;;  %v1996_v16 = vpop.permute.xlu1 %1995 }
 0x307   : > { %v2061_v24 = vsel %vm2057_vm0, %v2028_v26, %v1996_v16  ;;  %v2030_v25 = vsel %vm957_vm9, %v4557_v5, %v1965_v35 }
 0x308   : > { %3492 = vmatmul.mubr.msk.bf16.vlgmr.msra.gmra.mxu1 %vm2126_vm1, %v2061_v24 }
 0x30a   : > { %v1998_v52 = vpop.permute.xlu0 %1997  ;;  %v1967_v6 = vpop.permute.xlu1 %1966 }
 0x30b   : > { %v2063_v62 = vsel %vm2057_vm0, %v2030_v25, %v1998_v52  ;;  %v2032_v55 = vsel %vm957_vm9, %v4681_v63, %v1967_v6 }
 0x30c   : > { %3495 = vmatprep.mubr.msk.bf16.mxu1 %vm2126_vm1, %v2063_v62 }
 0x30e   : > { %v1969_v61 = vpop.permute.xlu0 %1968  ;;  %v2000_v18 = vpop.permute.xlu1 %1999 }
 0x30f   : > { %v2065_v53 = vsel %vm2057_vm0, %v2032_v55, %v2000_v18  ;;  %v2034_v32 = vsel %vm957_vm9, %v4659_v15, %v1969_v61  ;;  %v3046_v18 = vsub.s32 4, %v4196_v45 }
 0x310   : > { %3496 = vmatmul.mubr.msk.bf16.gmra.mxu1 %vm2126_vm1, %v2065_v53 }
 0x312   : > { %v2002_v50 = vpop.permute.xlu0 %2001  ;;  %v1971_v5 = vpop.permute.xlu1 %1970 }
 0x313   : > { %v2067_v7 = vsel %vm2057_vm0, %v2034_v32, %v2002_v50  ;;  %v2036_v34 = vsel %vm957_vm9, %v4718_v10, %v1971_v5  ;;  %v3672_v32 = vld [vmem:[%s5228_s3] sm:$0x3f]  ;;  %v3082_v5 = vsub.s32 5, %v4196_v45 }
 0x314   : > { %3499 = vmatprep.mubr.msk.bf16.mxu1 %vm2126_vm1, %v2067_v7  ;;  %v4978_v50 = vrot.slane %v3672_v32, %v3046_v18  ;;  %v2326_v7 = vsub.s32 2, %v4196_v45 }
 0x316   : > { %v1973_v42 = vpop.permute.xlu0 %1972  ;;  %v2004_v63 = vpop.permute.xlu1 %2003 }
 0x317   : > { %v2069_v13 = vsel %vm2057_vm0, %v2036_v34, %v2004_v63  ;;  %v2038_v40 = vsel %vm957_vm9, %v4663_v27, %v1973_v42  ;;  %v2362_v42 = vsub.s32 3, %v4196_v45 }
 0x318   : > { %3500 = vmatmul.mubr.msk.bf16.gmra.mxu1 %vm2126_vm1, %v2069_v13  ;;  %v4986_v13 = vrot.slane %v3672_v32, %v3082_v5 }
 0x31a   : > { %v2006_v30 = vpop.permute.xlu0 %2005  ;;  %v1975_v15 = vpop.permute.xlu1 %1974 }
 0x31b   : > { %v2071_v3 = vsel %vm2057_vm0, %v2038_v40, %v2006_v30  ;;  %v2040_v43 = vsel %vm957_vm9, %v4752_v2, %v1975_v15  ;;  %v4988_v40 = vrot.slane %v3672_v32, %v2326_v7  ;;  %v4992_v15 = vrot.slane %v3672_v32, %v2362_v42 }
 0x31c   : > { %3503 = vmatprep.mubr.msk.bf16.mxu1 %vm2126_vm1, %v2071_v3 }
 0x31e   : > { %v1977_v8 = vpop.permute.xlu0 %1976  ;;  %v2008_v10 = vpop.permute.xlu1 %2007 }
 0x31f   : > { %v2073_v14 = vsel %vm2057_vm0, %v2040_v43, %v2008_v10  ;;  %v2042_v51 = vsel %vm957_vm9, %v4670_v56, %v1977_v8 }
 0x320   : > { %3504 = vmatmul.mubr.msk.bf16.gmra.mxu1 %vm2126_vm1, %v2073_v14 }
 0x322   : > { %v2010_v22 = vpop.permute.xlu0 %2009  ;;  %v1979_v27 = vpop.permute.xlu1 %1978 }
 0x323   : > { %v2075_v31 = vsel %vm2057_vm0, %v2042_v51, %v2010_v22  ;;  %v2044_v9 = vsel %vm957_vm9, %v4768_v41, %v1979_v27 }
 0x324   : > { %3507 = vmatprep.mubr.msk.bf16.mxu1 %vm2126_vm1, %v2075_v31 }
 0x326   : > { %v1981_v33 = vpop.permute.xlu0 %1980  ;;  %v2012_v2 = vpop.permute.xlu1 %2011 }
 0x327   : > { %v2077_v59 = vsel %vm2057_vm0, %v2044_v9, %v2012_v2  ;;  %v2046_v20 = vsel %vm957_vm9, %v4696_v23, %v1981_v33 }
 0x328   : > { %3508 = vmatmul.mubr.msk.bf16.gmra.mxu1 %vm2126_vm1, %v2077_v59 }
 0x32a   : > { %v2014_v19 = vpop.permute.xlu0 %2013  ;;  %v1983_v56 = vpop.permute.xlu1 %1982 }
 0x32b   : > { %v2079_v0 = vsel %vm2057_vm0, %v2046_v20, %v2014_v19  ;;  %v2048_v4 = vsel %vm957_vm9, %v4798_v44, %v1983_v56  ;;  %v3527_v28 = vpop.f32.mrf.mxu0 }
 0x32c   : > { %3511 = vmatprep.mubr.msk.bf16.mxu1 %vm2126_vm1, %v2079_v0  ;;  %v3050_v63 = vmul.f32 %v3527_v28, %v4978_v50 }
 0x32d   : > { %v2917_v29 = vpop.f32.mrf.mxu0 }
 0x32e   : > { %v1985_v17 = vpop.permute.xlu0 %1984  ;;  %v2016_v41 = vpop.permute.xlu1 %2015  ;;  %v3086_v43 = vadd.f32 %v4986_v13, %v3050_v63  ;;  %v3048_v8 = vmul.f32 %v4978_v50, %v2917_v29 }
 0x32f   : > { %v2081_v12 = vsel %vm2057_vm0, %v2048_v4, %v2016_v41  ;;  %v2050_v37 = vsel %vm957_vm9, %v4742_v57, %v1985_v17  ;;  %v3528_v26 = vpop.f32.mrf.mxu0 }
 0x330   : > { %3512 = vmatmul.mubr.msk.bf16.gmra.mxu1 %vm2126_vm1, %v2081_v12  ;;  %v3051_v45 = vmul.f32 %v3528_v26, %v4978_v50  ;;  %v3084_v2 = vadd.f32 %v4986_v13, %v3048_v8 }
 0x331   : > { %v2920_v35 = vpop.f32.mrf.mxu0 }
 0x332   : > { %v2018_v58 = vpop.permute.xlu0 %2017  ;;  %v1987_v23 = vpop.permute.xlu1 %1986  ;;  %v3049_v31 = vmul.f32 %v4978_v50, %v2920_v35  ;;  %v3087_v0 = vadd.f32 %v4986_v13, %v3051_v45 }
 0x333   : > { %v2083_v36 = vsel %vm2057_vm0, %v2050_v37, %v2018_v58  ;;  %v2052_v54 = vsel %vm957_vm9, %v4825_v47, %v1987_v23 }
 0x334   : > { %3515 = vmatprep.mubr.msk.bf16.mxu1 %vm2126_vm1, %v2083_v36  ;;  %v3085_v58 = vadd.f32 %v4986_v13, %v3049_v31 }
 0x336   : > { %v1989_v49 = vpop.permute.xlu0 %1988  ;;  %v2020_v44 = vpop.permute.xlu1 %2019 }
 0x337   : > { %v2085_v46 = vsel %vm2057_vm0, %v2052_v54, %v2020_v44  ;;  %v2054_v60 = vsel %vm957_vm9, %v4851_v1, %v1989_v49 }
 0x338   : > { %3516 = vmatmul.mubr.msk.bf16.gmra.mxu1 %vm2126_vm1, %v2085_v46 }
 0x33a   : > { %v2022_v38 = vpop.permute.xlu0 %2021  ;;  %v1991_v57 = vpop.permute.xlu1 %1990 }
 0x33b   : > { %v2087_v48 = vsel %vm2057_vm0, %v2054_v60, %v2022_v38  ;;  %v2056_v21 = vsel %vm957_vm9, %v4870_v39, %v1991_v57 }
 0x33c   : > { %3519 = vmatprep.mubr.msk.bf16.mxu1 %vm2126_vm1, %v2087_v48 }
 0x33e   : > { %v2024_v11 = vpop.permute.xlu1 %2023 }
 0x33f   : > { %v2089_v47 = vsel %vm2057_vm0, %v2056_v21, %v2024_v11 }
 0x340   : > { %3520 = vmatmul.mubr.msk.bf16.gmra.mxu1 %vm2126_vm1, %v2089_v47 }
 0x355   : > { %v3531_v16 = vpop.f32.mrf.mxu0 }
 0x356   : > { %v3054_v9 = vmul.f32 %v3531_v16, %v4978_v50 }
 0x357   : > { %v2933_v1 = vpop.f32.mrf.mxu0 }
 0x358   : > { %v3090_v23 = vadd.f32 %v4986_v13, %v3054_v9  ;;  %v3052_v36 = vmul.f32 %v4978_v50, %v2933_v1 }
 0x359   : > { %v3532_v24 = vpop.f32.mrf.mxu0 }
 0x35a   : > { %v3055_v57 = vmul.f32 %v3532_v24, %v4978_v50  ;;  %v3088_v29 = vadd.f32 %v4986_v13, %v3052_v36 }
 0x35b   : > { %v4958_v25 = vpop.f32.mrf.mxu0 }
 0x35c   : > { %v3053_v26 = vmul.f32 %v4978_v50, %v4958_v25  ;;  %v3091_v7 = vadd.f32 %v4986_v13, %v3055_v57 }
 0x35e   : > { %v4960_v52 = vpop.f32.mrf.mxu0 }
 0x35f   : > { %v3058_v35 = vmul.f32 %v4960_v52, %v4978_v50 }
 0x360   : > { %v4962_v6 = vpop.f32.mrf.mxu0 }
 0x361   : > { %v3094_v8 = vadd.f32 %v4986_v13, %v3058_v35 }
 0x362   : > { %v4964_v62 = vpop.f32.mrf.mxu0 }
 0x364   : > { %v4966_v39 = vpop.f32.mrf.mxu0 }
 0x366   : > { %v4968_v55 = vpop.f32.mrf.mxu0 }
 0x368   : > { %v4970_v61 = vpop.f32.mrf.mxu0 }
 0x369   : > { %v3060_v57 = vmul.f32 %v4978_v50, %v4970_v61 }
 0x36a   : > { %v4973_v53 = vpop.f32.mrf.mxu0 }
 0x36c   : > { %v4982_v34 = vpop.f32.mrf.mxu0 }
 0x371   : > { %v4990_v30 = vpop.f32.mrf.mxu0 }
 0x373   : > { %v4997_v14 = vpop.f32.mrf.mxu0 }
 0x375   : > { %v5008_v56 = vpop.f32.mrf.mxu0 }
 0x377   : > { %v5025_v38 = vpop.f32.mrf.mxu0 }
 0x379   : > { %v5041_v5 = vpop.f32.mrf.mxu0 }
 0x37b   : > { %v5056_v9 = vpop.f32.mrf.mxu0 }
 0x3c8   : > { %v3493_v3 = vpop.f32.mrf.mxu1 }
 0x3c9   : > { %v2330_v10 = vmul.f32 %v3493_v3, %v4988_v40 }
 0x3ca   : > { %v2197_v51 = vpop.f32.mrf.mxu1 }
 0x3cb   : > { %v2366_v22 = vadd.f32 %v4992_v15, %v2330_v10  ;;  %v2328_v27 = vmul.f32 %v4988_v40, %v2197_v51  ;;  %v3056_v10 = vmul.f32 %v4978_v50, %v4962_v6 }
 0x3cc   : > { %v3494_v33 = vpop.f32.mrf.mxu1 }
 0x3cd   : > { %v3118_v59 = vadd.f32 %v3086_v43, %v2366_v22  ;;  %v2364_v20 = vadd.f32 %v4992_v15, %v2328_v27  ;;  %v2331_v19 = vmul.f32 %v3494_v33, %v4988_v40  ;;  %v3089_v43 = vadd.f32 %v4986_v13, %v3053_v26 }
 0x3ce   : > { %v2200_v4 = vpop.f32.mrf.mxu1  ;;  %v3059_v33 = vmul.f32 %v4964_v62, %v4978_v50  ;;  %v3063_v26 = vmul.f32 %v4973_v53, %v4978_v50 }
 0x3cf   : > { %v3150_v17 = vmax.f32 %v3118_v59, 0.0  ;;  %v3116_v41 = vadd.f32 %v3084_v2, %v2364_v20  ;;  %v2367_v12 = vadd.f32 %v4992_v15, %v2331_v19  ;;  %v2329_v37 = vmul.f32 %v4988_v40, %v2200_v4 }
 0x3d0   : > { %v3497_v54 = vpop.f32.mrf.mxu1  ;;  %v3057_v4 = vmul.f32 %v4978_v50, %v4966_v39  ;;  %v3095_v36 = vadd.f32 %v4986_v13, %v3059_v33 }
 0x3d1   : > { %3182 = vst.msk [vmem:[%s5014_s6 + $0x10] sm:$0xff] %vm806_vm7, %v3150_v17  ;;  %v3148_v49 = vmax.f32 %v3116_v41, 0.0  ;;  %v3119_v44 = vadd.f32 %v3087_v0, %v2367_v12  ;;  %v2365_v46 = vadd.f32 %v4992_v15, %v2329_v37  ;;  %v2334_v60 = vmul.f32 %v3497_v54, %v4988_v40 }
 0x3d2   : > { %v2213_v48 = vpop.f32.mrf.mxu1  ;;  %v3092_v0 = vadd.f32 %v4986_v13, %v3056_v10  ;;  %v3062_v17 = vmul.f32 %v4968_v55, %v4978_v50 }
 0x3d3   : > { %3180 = vst.msk [vmem:[%s5014_s6] sm:$0xff] %vm806_vm7, %v3148_v49  ;;  %v3151_v21 = vmax.f32 %v3119_v44, 0.0  ;;  %v3117_v11 = vadd.f32 %v3085_v58, %v2365_v46  ;;  %v2370_v47 = vadd.f32 %v4992_v15, %v2334_v60  ;;  %v2332_v28 = vmul.f32 %v4988_v40, %v2213_v48 }
 0x3d4   : > { %v3498_v16 = vpop.f32.mrf.mxu1  ;;  %v3093_v46 = vadd.f32 %v4986_v13, %v3057_v4  ;;  %v3098_v60 = vadd.f32 %v4986_v13, %v3062_v17 }
 0x3d5   : > { %3183 = vst.msk [vmem:[%s5014_s6 + $0x18] sm:$0xff] %vm806_vm7, %v3151_v21  ;;  %v3149_v1 = vmax.f32 %v3117_v11, 0.0  ;;  %v3122_v24 = vadd.f32 %v3090_v23, %v2370_v47  ;;  %v2368_v18 = vadd.f32 %v4992_v15, %v2332_v28  ;;  %v2335_v32 = vmul.f32 %v3498_v16, %v4988_v40  ;;  %v5073_v23 = vpop.f32.mrf.mxu0 }
 0x3d6   : > { %v2216_v42 = vpop.f32.mrf.mxu1 }
 0x3d7   : > { %3181 = vst.msk [vmem:[%s5014_s6 + $0x8] sm:$0xff] %vm806_vm7, %v3149_v1  ;;  %v3154_v25 = vmax.f32 %v3122_v24, 0.0  ;;  %v3120_v52 = vadd.f32 %v3088_v29, %v2368_v18  ;;  %v2371_v63 = vadd.f32 %v4992_v15, %v2335_v32  ;;  %v2333_v3 = vmul.f32 %v4988_v40, %v2216_v42  ;;  %v5088_v29 = vpop.f32.mrf.mxu0 }
 0x3d8   : > { %v3501_v45 = vpop.f32.mrf.mxu1  ;;  %v3096_v18 = vadd.f32 %v4986_v13, %v3060_v57  ;;  %v3061_v32 = vmul.f32 %v4978_v50, %v4982_v34 }
 0x3d9   : > { %3186 = vst.msk [vmem:[%s5014_s6 + $0x30] sm:$0xff] %vm806_vm7, %v3154_v25  ;;  %v3152_v51 = vmax.f32 %v3120_v52, 0.0  ;;  %v3123_v22 = vadd.f32 %v3091_v7, %v2371_v63  ;;  %v2369_v27 = vadd.f32 %v4992_v15, %v2333_v3  ;;  %v2338_v31 = vmul.f32 %v3501_v45, %v4988_v40  ;;  %v3551_v3 = vpop.f32.mrf.mxu0 }
 0x3da   : > { %v2229_v2 = vpop.f32.mrf.mxu1  ;;  %v3066_v7 = vmul.f32 %v4990_v30, %v4978_v50 }
 0x3db   : > { %3184 = vst.msk [vmem:[%s5014_s6 + $0x20] sm:$0xff] %vm806_vm7, %v3152_v51  ;;  %v3155_v59 = vmax.f32 %v3123_v22, 0.0  ;;  %v3121_v6 = vadd.f32 %v3089_v43, %v2369_v27  ;;  %v2374_v20 = vadd.f32 %v4992_v15, %v2338_v31  ;;  %v2336_v19 = vmul.f32 %v4988_v40, %v2229_v2 }
 0x3dc   : > { %v3502_v41 = vpop.f32.mrf.mxu1  ;;  %v3099_v43 = vadd.f32 %v4986_v13, %v3063_v26  ;;  %v3097_v51 = vadd.f32 %v4986_v13, %v3061_v32  ;;  %v3102_v22 = vadd.f32 %v4986_v13, %v3066_v7  ;;  %v3064_v27 = vmul.f32 %v4978_v50, %v4997_v14 }
 0x3dd   : > { %3187 = vst.msk [vmem:[%s5014_s6 + $0x38] sm:$0xff] %vm806_vm7, %v3155_v59  ;;  %v3153_v62 = vmax.f32 %v3121_v6, 0.0  ;;  %v3126_v12 = vadd.f32 %v3094_v8, %v2374_v20  ;;  %v2372_v37 = vadd.f32 %v4992_v15, %v2336_v19  ;;  %v2339_v58 = vmul.f32 %v3502_v41, %v4988_v40  ;;  %v3013_v20 = vpop.f32.mrf.mxu0 }
 0x3de   : > { %v2232_v54 = vpop.f32.mrf.mxu1  ;;  %v3067_v19 = vmul.f32 %v5008_v56, %v4978_v50 }
 0x3df   : > { %3185 = vst.msk [vmem:[%s5014_s6 + $0x28] sm:$0xff] %vm806_vm7, %v3153_v62  ;;  %v3158_v39 = vmax.f32 %v3126_v12, 0.0  ;;  %v3124_v55 = vadd.f32 %v3092_v0, %v2372_v37  ;;  %v2375_v49 = vadd.f32 %v4992_v15, %v2339_v58  ;;  %v2337_v44 = vmul.f32 %v4988_v40, %v2232_v54 }
 0x3e0   : > { %v3505_v48 = vpop.f32.mrf.mxu1  ;;  %v3100_v62 = vadd.f32 %v4986_v13, %v3064_v27  ;;  %v3065_v12 = vmul.f32 %v4978_v50, %v5025_v38  ;;  %v3070_v37 = vmul.f32 %v5041_v5, %v4978_v50  ;;  %v3072_v27 = vmul.f32 %v4978_v50, %v3013_v20 }
 0x3e1   : > { %3190 = vst.msk [vmem:[%s5014_s6 + $0x50] sm:$0xff] %vm806_vm7, %v3158_v39  ;;  %v3156_v21 = vmax.f32 %v3124_v55, 0.0  ;;  %v3127_v11 = vadd.f32 %v3095_v36, %v2375_v49  ;;  %v2373_v47 = vadd.f32 %v4992_v15, %v2337_v44  ;;  %v2342_v28 = vmul.f32 %v3505_v48, %v4988_v40  ;;  %v3552_v55 = vpop.f32.mrf.mxu0 }
 0x3e2   : > { %v2245_v35 = vpop.f32.mrf.mxu1  ;;  %v3103_v49 = vadd.f32 %v4986_v13, %v3067_v19  ;;  %v3101_v57 = vadd.f32 %v4986_v13, %v3065_v12  ;;  %v3106_v48 = vadd.f32 %v4986_v13, %v3070_v37 }
 0x3e3   : > { %3188 = vst.msk [vmem:[%s5014_s6 + $0x40] sm:$0xff] %vm806_vm7, %v3156_v21  ;;  %v3159_v16 = vmax.f32 %v3127_v11, 0.0  ;;  %v3125_v61 = vadd.f32 %v3093_v46, %v2373_v47  ;;  %v2378_v1 = vadd.f32 %v4992_v15, %v2342_v28  ;;  %v2340_v24 = vmul.f32 %v4988_v40, %v2245_v35 }
 0x3e4   : > { %v3506_v42 = vpop.f32.mrf.mxu1  ;;  %v3068_v21 = vmul.f32 %v4978_v50, %v5056_v9 }
 0x3e5   : > { %3191 = vst.msk [vmem:[%s5014_s6 + $0x58] sm:$0xff] %vm806_vm7, %v3159_v16  ;;  %v3157_v53 = vmax.f32 %v3125_v61, 0.0  ;;  %v3130_v25 = vadd.f32 %v3098_v60, %v2378_v1  ;;  %v2376_v52 = vadd.f32 %v4992_v15, %v2340_v24  ;;  %v2343_v63 = vmul.f32 %v3506_v42, %v4988_v40  ;;  %v3016_v16 = vpop.f32.mrf.mxu0 }
 0x3e6   : > { %v2248_v8 = vpop.f32.mrf.mxu1  ;;  %v3071_v61 = vmul.f32 %v5073_v23, %v4978_v50  ;;  %v3104_v7 = vadd.f32 %v4986_v13, %v3068_v21  ;;  %v3069_v42 = vmul.f32 %v4978_v50, %v5088_v29  ;;  %v3073_v12 = vmul.f32 %v4978_v50, %v3016_v16 }
 0x3e7   : > { %3189 = vst.msk [vmem:[%s5014_s6 + $0x48] sm:$0xff] %vm806_vm7, %v3157_v53  ;;  %v3162_v34 = vmax.f32 %v3130_v25, 0.0  ;;  %v3128_v10 = vadd.f32 %v3096_v18, %v2376_v52  ;;  %v2379_v30 = vadd.f32 %v4992_v15, %v2343_v63  ;;  %v2341_v45 = vmul.f32 %v4988_v40, %v2248_v8  ;;  %v3555_v8 = vpop.f32.mrf.mxu0 }
 0x3e8   : > { %v3509_v31 = vpop.f32.mrf.mxu1  ;;  %v3074_v53 = vmul.f32 %v3551_v3, %v4978_v50  ;;  %v3078_v37 = vmul.f32 %v3555_v8, %v4978_v50 }
 0x3e9   : > { %3194 = vst.msk [vmem:[%s5014_s6 + $0x70] sm:$0xff] %vm806_vm7, %v3162_v34  ;;  %v3160_v33 = vmax.f32 %v3128_v10, 0.0  ;;  %v3131_v2 = vadd.f32 %v3099_v43, %v2379_v30  ;;  %v2377_v59 = vadd.f32 %v4992_v15, %v2341_v45  ;;  %v2346_v6 = vmul.f32 %v3509_v31, %v4988_v40  ;;  %v3029_v19 = vpop.f32.mrf.mxu0 }
 0x3ea   : > { %v2261_v0 = vpop.f32.mrf.mxu1  ;;  %v3107_v34 = vadd.f32 %v4986_v13, %v3071_v61  ;;  %v3076_v21 = vmul.f32 %v4978_v50, %v3029_v19 }
 0x3eb   : > { %3192 = vst.msk [vmem:[%s5014_s6 + $0x60] sm:$0xff] %vm806_vm7, %v3160_v33  ;;  %v3163_v4 = vmax.f32 %v3131_v2, 0.0  ;;  %v3129_v14 = vadd.f32 %v3097_v51, %v2377_v59  ;;  %v2382_v17 = vadd.f32 %v4992_v15, %v2346_v6  ;;  %v2344_v41 = vmul.f32 %v4988_v40, %v2261_v0 }
 0x3ec   : > { %v3510_v58 = vpop.f32.mrf.mxu1  ;;  %v3105_v51 = vadd.f32 %v4986_v13, %v3069_v42  ;;  %v3075_v0 = vmul.f32 %v3552_v55, %v4978_v50  ;;  %v3556_v55 = vpop.f32.mrf.mxu0 }
 0x3ed   : > { %3195 = vst.msk [vmem:[%s5014_s6 + $0x78] sm:$0xff] %vm806_vm7, %v3163_v4  ;;  %v3161_v56 = vmax.f32 %v3129_v14, 0.0  ;;  %v3134_v36 = vadd.f32 %v3102_v22, %v2382_v17  ;;  %v2380_v54 = vadd.f32 %v4992_v15, %v2344_v41  ;;  %v2347_v39 = vmul.f32 %v3510_v58, %v4988_v40 }
 0x3ee   : > { %v2264_v44 = vpop.f32.mrf.mxu1  ;;  %v3110_v22 = vadd.f32 %v4986_v13, %v3074_v53  ;;  %v3032_v16 = vpop.f32.mrf.mxu0  ;;  %v3079_v61 = vmul.f32 %v3556_v55, %v4978_v50 }
 0x3ef   : > { %3193 = vst.msk [vmem:[%s5014_s6 + $0x68] sm:$0xff] %vm806_vm7, %v3161_v56  ;;  %v3166_v38 = vmax.f32 %v3134_v36, 0.0  ;;  %v3132_v46 = vadd.f32 %v3100_v62, %v2380_v54  ;;  %v2383_v5 = vadd.f32 %v4992_v15, %v2347_v39  ;;  %v2345_v60 = vmul.f32 %v4988_v40, %v2264_v44 }
 0x3f0   : > { %v3513_v11 = vpop.f32.mrf.mxu1  ;;  %v3108_v62 = vadd.f32 %v4986_v13, %v3072_v27  ;;  %v3077_v42 = vmul.f32 %v4978_v50, %v3032_v16 }
 0x3f1   : > { %3198 = vst.msk [vmem:[%s5014_s6 + $0x90] sm:$0xff] %vm806_vm7, %v3166_v38  ;;  %v3164_v47 = vmax.f32 %v3132_v46, 0.0  ;;  %v3135_v28 = vadd.f32 %v3103_v49, %v2383_v5  ;;  %v2381_v26 = vadd.f32 %v4992_v15, %v2345_v60  ;;  %v2350_v35 = vmul.f32 %v3513_v11, %v4988_v40 }
 0x3f2   : > { %v2277_v1 = vpop.f32.mrf.mxu1  ;;  %v3111_v49 = vadd.f32 %v4986_v13, %v3075_v0 }
 0x3f3   : > { %3196 = vst.msk [vmem:[%s5014_s6 + $0x80] sm:$0xff] %vm806_vm7, %v3164_v47  ;;  %v3167_v24 = vmax.f32 %v3135_v28, 0.0  ;;  %v3133_v9 = vadd.f32 %v3101_v57, %v2381_v26  ;;  %v2386_v18 = vadd.f32 %v4992_v15, %v2350_v35  ;;  %v2348_v32 = vmul.f32 %v4988_v40, %v2277_v1 }
 0x3f4   : > { %v3514_v25 = vpop.f32.mrf.mxu1  ;;  %v3109_v57 = vadd.f32 %v4986_v13, %v3073_v12 }
 0x3f5   : > { %3199 = vst.msk [vmem:[%s5014_s6 + $0x98] sm:$0xff] %vm806_vm7, %v3167_v24  ;;  %v3165_v23 = vmax.f32 %v3133_v9, 0.0  ;;  %v3138_v52 = vadd.f32 %v3106_v48, %v2386_v18  ;;  %v2384_v63 = vadd.f32 %v4992_v15, %v2348_v32  ;;  %v2351_v43 = vmul.f32 %v3514_v25, %v4988_v40 }
 0x3f6   : > { %v2280_v10 = vpop.f32.mrf.mxu1  ;;  %v3114_v48 = vadd.f32 %v4986_v13, %v3078_v37 }
 0x3f7   : > { %3197 = vst.msk [vmem:[%s5014_s6 + $0x88] sm:$0xff] %vm806_vm7, %v3165_v23  ;;  %v3170_v30 = vmax.f32 %v3138_v52, 0.0  ;;  %v3136_v29 = vadd.f32 %v3104_v7, %v2384_v63  ;;  %v2387_v3 = vadd.f32 %v4992_v15, %v2351_v43  ;;  %v2349_v45 = vmul.f32 %v4988_v40, %v2280_v10 }
 0x3f8   : > { %v3517_v31 = vpop.f32.mrf.mxu1  ;;  %v3112_v7 = vadd.f32 %v4986_v13, %v3076_v21  ;;  %v3115_v43 = vadd.f32 %v4986_v13, %v3079_v61 }
 0x3f9   : > { %3202 = vst.msk [vmem:[%s5014_s6 + $0xb0] sm:$0xff] %vm806_vm7, %v3170_v30  ;;  %v3168_v33 = vmax.f32 %v3136_v29, 0.0  ;;  %v3139_v2 = vadd.f32 %v3107_v34, %v2387_v3  ;;  %v2385_v59 = vadd.f32 %v4992_v15, %v2349_v45  ;;  %v2354_v6 = vmul.f32 %v3517_v31, %v4988_v40 }
 0x3fa   : > { %v2293_v4 = vpop.f32.mrf.mxu1  ;;  %v3113_v29 = vadd.f32 %v4986_v13, %v3077_v42 }
 0x3fb   : > { %3200 = vst.msk [vmem:[%s5014_s6 + $0xa0] sm:$0xff] %vm806_vm7, %v3168_v33  ;;  %v3171_v14 = vmax.f32 %v3139_v2, 0.0  ;;  %v3137_v17 = vadd.f32 %v3105_v51, %v2385_v59  ;;  %v2390_v20 = vadd.f32 %v4992_v15, %v2354_v6  ;;  %v2352_v41 = vmul.f32 %v4988_v40, %v2293_v4 }
 0x3fc   : > { %v3518_v58 = vpop.f32.mrf.mxu1 }
 0x3fd   : > { %3203 = vst.msk [vmem:[%s5014_s6 + $0xb8] sm:$0xff] %vm806_vm7, %v3171_v14  ;;  %v3169_v56 = vmax.f32 %v3137_v17, 0.0  ;;  %v3142_v36 = vadd.f32 %v3110_v22, %v2390_v20  ;;  %v2388_v54 = vadd.f32 %v4992_v15, %v2352_v41  ;;  %v2355_v39 = vmul.f32 %v3518_v58, %v4988_v40 }
 0x3fe   : > { %v2296_v44 = vpop.f32.mrf.mxu1 }
 0x3ff   : > { %3201 = vst.msk [vmem:[%s5014_s6 + $0xa8] sm:$0xff] %vm806_vm7, %v3169_v56  ;;  %v3174_v38 = vmax.f32 %v3142_v36, 0.0  ;;  %v3140_v46 = vadd.f32 %v3108_v62, %v2388_v54  ;;  %v2391_v5 = vadd.f32 %v4992_v15, %v2355_v39  ;;  %v2353_v60 = vmul.f32 %v4988_v40, %v2296_v44 }
 0x400   : > { %v3521_v11 = vpop.f32.mrf.mxu1 }
 0x401   : > { %3206 = vst.msk [vmem:[%s5014_s6 + $0xd0] sm:$0xff] %vm806_vm7, %v3174_v38  ;;  %v3172_v47 = vmax.f32 %v3140_v46, 0.0  ;;  %v3143_v28 = vadd.f32 %v3111_v49, %v2391_v5  ;;  %v2389_v26 = vadd.f32 %v4992_v15, %v2353_v60  ;;  %v2358_v35 = vmul.f32 %v3521_v11, %v4988_v40 }
 0x402   : > { %v2309_v1 = vpop.f32.mrf.mxu1 }
 0x403   : > { %3204 = vst.msk [vmem:[%s5014_s6 + $0xc0] sm:$0xff] %vm806_vm7, %v3172_v47  ;;  %v3175_v24 = vmax.f32 %v3143_v28, 0.0  ;;  %v3141_v9 = vadd.f32 %v3109_v57, %v2389_v26  ;;  %v2394_v18 = vadd.f32 %v4992_v15, %v2358_v35  ;;  %v2356_v32 = vmul.f32 %v4988_v40, %v2309_v1 }
 0x404   : > { %v3522_v53 = vpop.f32.mrf.mxu1 }
 0x405   : > { %3207 = vst.msk [vmem:[%s5014_s6 + $0xd8] sm:$0xff] %vm806_vm7, %v3175_v24  ;;  %v3173_v25 = vmax.f32 %v3141_v9, 0.0  ;;  %v3146_v23 = vadd.f32 %v3114_v48, %v2394_v18  ;;  %v2392_v52 = vadd.f32 %v4992_v15, %v2356_v32  ;;  %v2359_v63 = vmul.f32 %v3522_v53, %v4988_v40 }
 0x406   : > { %v2312_v8 = vpop.f32.mrf.mxu1 }
 0x407   : > { %3205 = vst.msk [vmem:[%s5014_s6 + $0xc8] sm:$0xff] %vm806_vm7, %v3173_v25  ;;  %v3178_v34 = vmax.f32 %v3146_v23, 0.0  ;;  %v3144_v10 = vadd.f32 %v3112_v7, %v2392_v52  ;;  %v2395_v50 = vadd.f32 %v4992_v15, %v2359_v63  ;;  %v2357_v30 = vmul.f32 %v4988_v40, %v2312_v8 }
 0x409   : > { %3210 = vst.msk [vmem:[%s5014_s6 + $0xf0] sm:$0xff] %vm806_vm7, %v3178_v34  ;;  %v3176_v3 = vmax.f32 %v3144_v10, 0.0  ;;  %v3147_v45 = vadd.f32 %v3115_v43, %v2395_v50  ;;  %v2393_v51 = vadd.f32 %v4992_v15, %v2357_v30 }
 0x40b   : > { %3208 = vst.msk [vmem:[%s5014_s6 + $0xe0] sm:$0xff] %vm806_vm7, %v3176_v3  ;;  %v3179_v22 = vmax.f32 %v3147_v45, 0.0  ;;  %v3145_v27 = vadd.f32 %v3113_v29, %v2393_v51 }
 0x40d   : > { %3211 = vst.msk [vmem:[%s5014_s6 + $0xf8] sm:$0xff] %vm806_vm7, %v3179_v22  ;;  %v3177_v31 = vmax.f32 %v3145_v27, 0.0 }
 0x40f   : > { %3209 = vst.msk [vmem:[%s5014_s6 + $0xe8] sm:$0xff] %vm806_vm7, %v3177_v31 }
 0x410 PF: > { %s15_s18 = sadd.s32 1, %s3679_s18  }
 0x411   : > { %p12_p4 = scmp.ge.s32.totalorder %s15_s18, 4  }
 0x413   :  { %14 = sbr.rel (!%p12_p4) target bundleno = 1 (0x1), region = 70 }

</bundles_post_ra>
